<compile_context>
chip_gen: v5e
topology: v5e:2x2
jax: 0.10.0
libtpu: 0.0.40
codegen_flags: <defaults>
</compile_context>

<pallas_src>
import jax
import jax.numpy as jnp
from jax import lax  # noqa: F401  (kept for parity with reference impl style)
from jax.experimental import pallas as pl
from jax.experimental.pallas import tpu as pltpu

LANE = 128  # TPU lane width; logit last dims are padded to a multiple of this


# ----------------------------------------------------------------------------
# helpers
# ----------------------------------------------------------------------------
def _gelu(x):
    # tanh-approx GELU in f32 (tanh lowers to the EUP -> off the VALU path)
    c = jnp.float32(0.7978845608028654)  # sqrt(2/pi)
    return 0.5 * x * (1.0 + jnp.tanh(c * (x + 0.044715 * x * x * x)))


def _const_spec(shape):
    """BlockSpec for a grid-invariant weight: single-buffered if supported."""
    try:
        return pl.BlockSpec(shape, lambda bb, r: (0, 0),
                            pipeline_mode=pl.Buffered(buffer_count=1))
    except TypeError:  # older BlockSpec without pipeline_mode kwarg
        return pl.BlockSpec(shape, lambda bb, r: (0, 0))


def _vmem_limit_bytes():
    """Generation-aware VMEM limit with headroom (not the full capacity)."""
    try:
        cap = int(pltpu.get_tpu_info().vmem_capacity_bytes)
    except Exception:
        cap = 64 * 1024 * 1024
    return min((cap * 3) // 4, 100 * 1024 * 1024)


# ----------------------------------------------------------------------------
# fused encoder + joint-decoder kernel
# grid = (B // Bb, R):  batch blocks (parallel) x relations (arbitrary)
# ----------------------------------------------------------------------------
def _fused_kernel(emb_ref, w_enc_ref, b_enc_ref, w_ner_ref, b_ner_ref,
                  w_head_ref, w_tail_ref, u_re_ref, b_re_ref,
                  hid_ref, ner_ref, re_ref,
                  head_sc, tail_t_sc):
    bb, seq, edim = emb_ref.shape
    hdim = w_enc_ref.shape[1]
    lpad = w_ner_ref.shape[1]
    r = pl.program_id(1)

    # ---- shared work: encoder, NER head, head/tail projections (r == 0) ----
    @pl.when(r == 0)
    def _():
        # flatten the batch block: Bb*S rows through every shared MXU pass
        x = emb_ref[...].reshape(bb * seq, edim)                     # bf16
        h32 = jnp.dot(x, w_enc_ref[...], preferred_element_type=jnp.float32)
        h32 = _gelu(h32 + b_enc_ref[...])                            # f32
        hid_ref[...] = h32.reshape(bb, seq, hdim).astype(hid_ref.dtype)
        h = h32.astype(jnp.bfloat16)                                 # bf16 hot path

        ner = jnp.dot(h, w_ner_ref[...], preferred_element_type=jnp.float32)
        ner = ner + b_ner_ref[...]
        ner_ref[...] = ner.reshape(bb, seq, lpad).astype(ner_ref.dtype)

        head = jnp.dot(h, w_head_ref[...], preferred_element_type=jnp.float32)
        tail = jnp.dot(h, w_tail_ref[...], preferred_element_type=jnp.float32)
        head_sc[...] = head.reshape(bb, seq, hdim).astype(head_sc.dtype)
        # hoist the tail transpose out of the relation loop: one vxpose per
        # batch element, reused for all R relations.
        tail3 = tail.reshape(bb, seq, hdim)
        for b in range(bb):
            tail_t_sc[b] = tail3[b].T.astype(tail_t_sc.dtype)

    # ---- one relation per grid step: re[b, r] = (head U_r) tail^T + b_r ----
    u_r = u_re_ref[0]                                                # [H, H] bf16
    b_r = b_re_ref[r]                                                # scalar (SMEM)
    for b in range(bb):                                              # Bb small: static unroll
        hu = jnp.dot(head_sc[b], u_r, preferred_element_type=jnp.float32)
        sc = jnp.dot(hu.astype(jnp.bfloat16), tail_t_sc[b],
                     preferred_element_type=jnp.float32)             # [S, S]
        re_ref[b, 0] = (sc + b_r).astype(re_ref.dtype)


# ----------------------------------------------------------------------------
# parameter preparation (one-time layout work: padding, bf16 casts)
# ----------------------------------------------------------------------------
def prepare_params(p, *, lane=LANE):
    H = p["w_enc"].shape[1]
    L = p["w_ner"].shape[1]
    l_pad = max(lane, ((L + lane - 1) // lane) * lane)

    w_ner_p = jnp.zeros((H, l_pad), jnp.float32).at[:, :L].set(p["w_ner"])
    b_ner_p = jnp.zeros((1, l_pad), jnp.float32).at[:, :L].set(p["b_ner"])

    return {
        "emb_table": p["emb_table"].astype(jnp.bfloat16),
        "w_enc":     p["w_enc"].astype(jnp.bfloat16),
        "b_enc":     p["b_enc"].astype(jnp.float32),
        "w_ner_p":   w_ner_p.astype(jnp.bfloat16),
        "b_ner_p":   b_ner_p,                                        # f32
        "w_head":    p["w_head"].astype(jnp.bfloat16),
        "w_tail":    p["w_tail"].astype(jnp.bfloat16),
        "u_re":      p["u_re"].astype(jnp.bfloat16),                 # [R, H, H]
        "b_re":      p["b_re"].reshape(-1).astype(jnp.float32),      # (R,) -> SMEM
        "l_ner":     L,
    }


# ----------------------------------------------------------------------------
# JointNERAndREModel.forward:  batch -> fused encoder+decoder -> batch
# ----------------------------------------------------------------------------
def joint_ner_and_re_forward(batch, kp, *, block_b=None):
    """batch: dict with 'token_ids' [B, S] int32. Returns augmented dict."""
    # TODO(synk): fuse this gather into the kernel (scalar-prefetch token_ids)
    emb = jnp.take(kp["emb_table"], batch["token_ids"], axis=0)      # [B, S, E] bf16
    B, S, E = emb.shape
    H = kp["w_enc"].shape[1]
    L_pad = kp["w_ner_p"].shape[1]
    R = kp["u_re"].shape[0]

    if block_b is None:
        block_b = 2 if B % 2 == 0 else 1    # fill the 256-wide MXU on v6e/v7x
    assert B % block_b == 0
    nb = B // block_b

    hidden, ner_pad, re_logits = pl.pallas_call(
        _fused_kernel,
        out_shape=(
            jax.ShapeDtypeStruct((B, S, H), jnp.float32),            # hidden
            jax.ShapeDtypeStruct((B, S, L_pad), jnp.bfloat16),       # ner (padded)
            jax.ShapeDtypeStruct((B, R, S, S), jnp.bfloat16),        # re
        ),
        grid=(nb, R),
        in_specs=[
            pl.BlockSpec((block_b, S, E), lambda bb, r: (bb, 0, 0)),  # emb (dbl-buf)
            _const_spec((E, H)),                                      # w_enc
            _const_spec((1, H)),                                      # b_enc
            _const_spec((H, L_pad)),                                  # w_ner (padded)
            _const_spec((1, L_pad)),                                  # b_ner (padded)
            _const_spec((H, H)),                                      # w_head
            _const_spec((H, H)),                                      # w_tail
            pl.BlockSpec((1, H, H), lambda bb, r: (r, 0, 0)),         # u_re streamed per r
            pl.BlockSpec(memory_space=pltpu.MemorySpace.SMEM),        # b_re scalars
        ],
        out_specs=(
            pl.BlockSpec((block_b, S, H), lambda bb, r: (bb, 0, 0)),
            pl.BlockSpec((block_b, S, L_pad), lambda bb, r: (bb, 0, 0)),
            pl.BlockSpec((block_b, 1, S, S), lambda bb, r: (bb, r, 0, 0)),
        ),
        scratch_shapes=[
            pltpu.VMEM((block_b, S, H), jnp.bfloat16),                # head
            pltpu.VMEM((block_b, H, S), jnp.bfloat16),                # tail^T (hoisted)
        ],
        compiler_params=pltpu.CompilerParams(
            dimension_semantics=("parallel", "arbitrary"),
            vmem_limit_bytes=_vmem_limit_bytes()),
    )(emb, kp["w_enc"], kp["b_enc"], kp["w_ner_p"], kp["b_ner_p"],
      kp["w_head"], kp["w_tail"], kp["u_re"], kp["b_re"])

    out = dict(batch)
    out["hidden"] = hidden
    out["ner_logits"] = ner_pad[..., :kp["l_ner"]]                   # [B, S, L_ner]
    out["re_logits"] = re_logits                                     # [B, R, S, S]
    return out


# ----------------------------------------------------------------------------
# reference implementation (pure JAX, f32) for a sanity check
# ----------------------------------------------------------------------------
def _reference(batch, params):
    emb = jnp.take(params["emb_table"], batch["token_ids"], axis=0)
    h = _gelu(jnp.einsum("bse,eh->bsh", emb, params["w_enc"]) + params["b_enc"])
    ner = jnp.einsum("bsh,hl->bsl", h, params["w_ner"]) + params["b_ner"]
    head = jnp.einsum("bsh,hk->bsk", h, params["w_head"])
    tail = jnp.einsum("bsh,hk->bsk", h, params["w_tail"])
    re = jnp.einsum("bik,rkm,bjm->brij", head, params["u_re"], tail)
    re = re + params["b_re"].reshape(1, -1, 1, 1)
    return h, ner, re


if __name__ == "__main__":
    # small but TPU-friendly shapes (lane-dense: S, E, H multiples of 128)
    B, S, V, E, H = 2, 128, 64, 128, 128
    L_NER, R = 8, 4

    key = jax.random.PRNGKey(0)
    ks = jax.random.split(key, 9)

    params = {
        "emb_table": 0.1 * jax.random.normal(ks[0], (V, E), jnp.float32),
        "w_enc":     0.1 * jax.random.normal(ks[1], (E, H), jnp.float32),
        "b_enc":     0.1 * jax.random.normal(ks[2], (1, H), jnp.float32),
        "w_ner":     0.1 * jax.random.normal(ks[3], (H, L_NER), jnp.float32),
        "b_ner":     0.1 * jax.random.normal(ks[4], (1, L_NER), jnp.float32),
        "w_head":    0.1 * jax.random.normal(ks[5], (H, H), jnp.float32),
        "w_tail":    0.1 * jax.random.normal(ks[6], (H, H), jnp.float32),
        "u_re":      0.1 * jax.random.normal(ks[7], (R, H, H), jnp.float32),
        "b_re":      0.1 * jax.random.normal(ks[8], (R,), jnp.float32),
    }

    token_ids = jax.random.randint(jax.random.PRNGKey(1), (B, S), 0, V,
                                   dtype=jnp.int32)
    batch = {"token_ids": token_ids}

    kernel_params = prepare_params(params)
    out = joint_ner_and_re_forward(batch, kernel_params)
    jax.block_until_ready(out["re_logits"])

    # correctness check against pure-JAX f32 reference
    # (bf16 MXU path + bf16 logit stores -> looser tolerance on the logits)
    h_ref, ner_ref, re_ref = _reference(batch, params)
    assert jnp.allclose(out["hidden"], h_ref, atol=1e-2, rtol=1e-2)
    assert jnp.allclose(out["ner_logits"].astype(jnp.float32), ner_ref,
                        atol=2e-2, rtol=2e-2)
    assert jnp.allclose(out["re_logits"].astype(jnp.float32), re_ref,
                        atol=2e-2, rtol=2e-2)

    print("KERNEL_OK")
</pallas_src>

<mosaic_0001>
module attributes {stable_mosaic.version = 11 : i64} {
  func.func @_fused_kernel(%arg0: i32, %arg1: i32, %arg2: memref<2x128x128xbf16, #tpu.memory_space<vmem>>, %arg3: memref<128x128xbf16, #tpu.memory_space<vmem>>, %arg4: memref<1x128xf32, #tpu.memory_space<vmem>>, %arg5: memref<128x128xbf16, #tpu.memory_space<vmem>>, %arg6: memref<1x128xf32, #tpu.memory_space<vmem>>, %arg7: memref<128x128xbf16, #tpu.memory_space<vmem>>, %arg8: memref<128x128xbf16, #tpu.memory_space<vmem>>, %arg9: memref<1x128x128xbf16, #tpu.memory_space<vmem>>, %arg10: memref<4xf32, #tpu.memory_space<smem>>, %arg11: memref<2x128x128xf32, #tpu.memory_space<vmem>>, %arg12: memref<2x128x128xbf16, #tpu.memory_space<vmem>>, %arg13: memref<2x1x128x128xbf16, #tpu.memory_space<vmem>>, %arg14: memref<2x128x128xbf16, #tpu.memory_space<vmem>>, %arg15: memref<2x128x128xbf16, #tpu.memory_space<vmem>>) attributes {dimension_semantics = [#tpu.dimension_semantics<parallel>, #tpu.dimension_semantics<arbitrary>], iteration_bounds = array<i64: 1, 4>, scalar_prefetch = 0 : i64, scratch_operands = 2 : i64, tpu.core_type = #tpu.core_type<tc>, window_params = [{transform_indices = @transform_0, window_bounds = array<i64: 2, 128, 128>}, {pipeline_mode = #tpu.pipeline_mode<synchronous>, transform_indices = @transform_1, window_bounds = array<i64: 128, 128>}, {pipeline_mode = #tpu.pipeline_mode<synchronous>, transform_indices = @transform_2, window_bounds = array<i64: 1, 128>}, {pipeline_mode = #tpu.pipeline_mode<synchronous>, transform_indices = @transform_3, window_bounds = array<i64: 128, 128>}, {pipeline_mode = #tpu.pipeline_mode<synchronous>, transform_indices = @transform_4, window_bounds = array<i64: 1, 128>}, {pipeline_mode = #tpu.pipeline_mode<synchronous>, transform_indices = @transform_5, window_bounds = array<i64: 128, 128>}, {pipeline_mode = #tpu.pipeline_mode<synchronous>, transform_indices = @transform_6, window_bounds = array<i64: 128, 128>}, {transform_indices = @transform_7, window_bounds = array<i64: 1, 128, 128>}, {transform_indices = @transform_8, window_bounds = array<i64: 4>}, {transform_indices = @transform_9, window_bounds = array<i64: 2, 128, 128>}, {transform_indices = @transform_10, window_bounds = array<i64: 2, 128, 128>}, {transform_indices = @transform_11, window_bounds = array<i64: 2, 1, 128, 128>}]} {
    %c0_i32 = arith.constant 0 : i32
    %0 = arith.cmpi eq, %arg1, %c0_i32 : i32
    %1 = arith.extui %0 : i1 to i32
    %c0_i32_0 = arith.constant 0 : i32
    %2 = arith.cmpi ne, %1, %c0_i32_0 : i32
    scf.if %2 {
      %c0_25 = arith.constant 0 : index
      %c0_26 = arith.constant 0 : index
      %c0_27 = arith.constant 0 : index
      %33 = vector.load %arg2[%c0_25, %c0_26, %c0_27] : memref<2x128x128xbf16, #tpu.memory_space<vmem>>, vector<2x128x128xbf16>
      %34 = vector.shape_cast %33 : vector<2x128x128xbf16> to vector<256x128xbf16>
      %c0_28 = arith.constant 0 : index
      %c0_29 = arith.constant 0 : index
      %35 = vector.load %arg3[%c0_28, %c0_29] : memref<128x128xbf16, #tpu.memory_space<vmem>>, vector<128x128xbf16>
      %cst_30 = arith.constant dense<0.000000e+00> : vector<256x128xf32>
      %36 = tpu.matmul %34, %35, %cst_30 {dimension_numbers = #tpu.dot_dimension_numbers<[1], [0], [0], [1], [0, 0, 1, 1], [], []>} : vector<256x128xbf16>, vector<128x128xbf16>, vector<256x128xf32> -> vector<256x128xf32>
      %c0_31 = arith.constant 0 : index
      %c0_32 = arith.constant 0 : index
      %37 = vector.load %arg4[%c0_31, %c0_32] : memref<1x128xf32, #tpu.memory_space<vmem>>, vector<1x128xf32>
      %38 = vector.broadcast %37 : vector<1x128xf32> to vector<256x128xf32>
      %39 = arith.addf %36, %38 : vector<256x128xf32>
      %cst_33 = arith.constant 5.000000e-01 : f32
      %40 = vector.broadcast %cst_33 : f32 to vector<256x128xf32>
      %41 = arith.mulf %40, %39 : vector<256x128xf32>
      %cst_34 = arith.constant 4.471500e-02 : f32
      %42 = vector.broadcast %cst_34 : f32 to vector<256x128xf32>
      %43 = arith.mulf %42, %39 : vector<256x128xf32>
      %44 = arith.mulf %43, %39 : vector<256x128xf32>
      %45 = arith.mulf %44, %39 : vector<256x128xf32>
      %46 = arith.addf %39, %45 : vector<256x128xf32>
      %cst_35 = arith.constant 0.797884583 : f32
      %47 = vector.broadcast %cst_35 : f32 to vector<256x128xf32>
      %48 = arith.mulf %47, %46 : vector<256x128xf32>
      %49 = math.tanh %48 : vector<256x128xf32>
      %cst_36 = arith.constant 1.000000e+00 : f32
      %50 = vector.broadcast %cst_36 : f32 to vector<256x128xf32>
      %51 = arith.addf %50, %49 : vector<256x128xf32>
      %52 = arith.mulf %41, %51 : vector<256x128xf32>
      %53 = vector.shape_cast %52 : vector<256x128xf32> to vector<2x128x128xf32>
      %c0_37 = arith.constant 0 : index
      %c0_38 = arith.constant 0 : index
      %c0_39 = arith.constant 0 : index
      %54 = vector.load %arg11[%c0_37, %c0_38, %c0_39] : memref<2x128x128xf32, #tpu.memory_space<vmem>>, vector<2x128x128xf32>
      tpu.vector_store %arg11[%c0_37, %c0_38, %c0_39], %53 {strides = array<i32>} : memref<2x128x128xf32, #tpu.memory_space<vmem>>, vector<2x128x128xf32>,
      %55 = arith.truncf %52 : vector<256x128xf32> to vector<256x128xbf16>
      %c0_40 = arith.constant 0 : index
      %c0_41 = arith.constant 0 : index
      %56 = vector.load %arg5[%c0_40, %c0_41] : memref<128x128xbf16, #tpu.memory_space<vmem>>, vector<128x128xbf16>
      %cst_42 = arith.constant dense<0.000000e+00> : vector<256x128xf32>
      %57 = tpu.matmul %55, %56, %cst_42 {dimension_numbers = #tpu.dot_dimension_numbers<[1], [0], [0], [1], [0, 0, 1, 1], [], []>} : vector<256x128xbf16>, vector<128x128xbf16>, vector<256x128xf32> -> vector<256x128xf32>
      %c0_43 = arith.constant 0 : index
      %c0_44 = arith.constant 0 : index
      %58 = vector.load %arg6[%c0_43, %c0_44] : memref<1x128xf32, #tpu.memory_space<vmem>>, vector<1x128xf32>
      %59 = vector.broadcast %58 : vector<1x128xf32> to vector<256x128xf32>
      %60 = arith.addf %57, %59 : vector<256x128xf32>
      %61 = vector.shape_cast %60 : vector<256x128xf32> to vector<2x128x128xf32>
      %62 = arith.truncf %61 : vector<2x128x128xf32> to vector<2x128x128xbf16>
      %c0_45 = arith.constant 0 : index
      %c0_46 = arith.constant 0 : index
      %c0_47 = arith.constant 0 : index
      %63 = vector.load %arg12[%c0_45, %c0_46, %c0_47] : memref<2x128x128xbf16, #tpu.memory_space<vmem>>, vector<2x128x128xbf16>
      tpu.vector_store %arg12[%c0_45, %c0_46, %c0_47], %62 {strides = array<i32>} : memref<2x128x128xbf16, #tpu.memory_space<vmem>>, vector<2x128x128xbf16>,
      %c0_48 = arith.constant 0 : index
      %c0_49 = arith.constant 0 : index
      %64 = vector.load %arg7[%c0_48, %c0_49] : memref<128x128xbf16, #tpu.memory_space<vmem>>, vector<128x128xbf16>
      %cst_50 = arith.constant dense<0.000000e+00> : vector<256x128xf32>
      %65 = tpu.matmul %55, %64, %cst_50 {dimension_numbers = #tpu.dot_dimension_numbers<[1], [0], [0], [1], [0, 0, 1, 1], [], []>} : vector<256x128xbf16>, vector<128x128xbf16>, vector<256x128xf32> -> vector<256x128xf32>
      %c0_51 = arith.constant 0 : index
      %c0_52 = arith.constant 0 : index
      %66 = vector.load %arg8[%c0_51, %c0_52] : memref<128x128xbf16, #tpu.memory_space<vmem>>, vector<128x128xbf16>
      %cst_53 = arith.constant dense<0.000000e+00> : vector<256x128xf32>
      %67 = tpu.matmul %55, %66, %cst_53 {dimension_numbers = #tpu.dot_dimension_numbers<[1], [0], [0], [1], [0, 0, 1, 1], [], []>} : vector<256x128xbf16>, vector<128x128xbf16>, vector<256x128xf32> -> vector<256x128xf32>
      %68 = vector.shape_cast %65 : vector<256x128xf32> to vector<2x128x128xf32>
      %69 = arith.truncf %68 : vector<2x128x128xf32> to vector<2x128x128xbf16>
      %c0_54 = arith.constant 0 : index
      %c0_55 = arith.constant 0 : index
      %c0_56 = arith.constant 0 : index
      %70 = vector.load %arg14[%c0_54, %c0_55, %c0_56] : memref<2x128x128xbf16, #tpu.memory_space<vmem>>, vector<2x128x128xbf16>
      tpu.vector_store %arg14[%c0_54, %c0_55, %c0_56], %69 {strides = array<i32>} : memref<2x128x128xbf16, #tpu.memory_space<vmem>>, vector<2x128x128xbf16>,
      %71 = vector.shape_cast %67 : vector<256x128xf32> to vector<2x128x128xf32>
      %72 = vector.extract_strided_slice %71 {offsets = [0, 0, 0], sizes = [1, 128, 128], strides = [1, 1, 1]} : vector<2x128x128xf32> to vector<1x128x128xf32>
      %73 = vector.shape_cast %72 : vector<1x128x128xf32> to vector<128x128xf32>
      %74 = tpu.transpose %73, [1, 0] : vector<128x128xf32> -> vector<128x128xf32>
      %75 = arith.truncf %74 : vector<128x128xf32> to vector<128x128xbf16>
      %c0_57 = arith.constant 0 : index
      %c0_58 = arith.constant 0 : index
      %c0_59 = arith.constant 0 : index
      %76 = vector.load %arg15[%c0_57, %c0_58, %c0_59] : memref<2x128x128xbf16, #tpu.memory_space<vmem>>, vector<1x128x128xbf16>
      %77 = vector.shape_cast %76 : vector<1x128x128xbf16> to vector<128x128xbf16>
      %78 = vector.shape_cast %75 : vector<128x128xbf16> to vector<1x128x128xbf16>
      tpu.vector_store %arg15[%c0_57, %c0_58, %c0_59], %78 {strides = array<i32>} : memref<2x128x128xbf16, #tpu.memory_space<vmem>>, vector<1x128x128xbf16>,
      %79 = vector.extract_strided_slice %71 {offsets = [1, 0, 0], sizes = [1, 128, 128], strides = [1, 1, 1]} : vector<2x128x128xf32> to vector<1x128x128xf32>
      %80 = vector.shape_cast %79 : vector<1x128x128xf32> to vector<128x128xf32>
      %81 = tpu.transpose %80, [1, 0] : vector<128x128xf32> -> vector<128x128xf32>
      %82 = arith.truncf %81 : vector<128x128xf32> to vector<128x128xbf16>
      %c1_60 = arith.constant 1 : index
      %c0_61 = arith.constant 0 : index
      %c0_62 = arith.constant 0 : index
      %83 = vector.load %arg15[%c1_60, %c0_61, %c0_62] : memref<2x128x128xbf16, #tpu.memory_space<vmem>>, vector<1x128x128xbf16>
      %84 = vector.shape_cast %83 : vector<1x128x128xbf16> to vector<128x128xbf16>
      %85 = vector.shape_cast %82 : vector<128x128xbf16> to vector<1x128x128xbf16>
      tpu.vector_store %arg15[%c1_60, %c0_61, %c0_62], %85 {strides = array<i32>} : memref<2x128x128xbf16, #tpu.memory_space<vmem>>, vector<1x128x128xbf16>,
    } else {
    }
    %c0 = arith.constant 0 : index
    %c0_1 = arith.constant 0 : index
    %c0_2 = arith.constant 0 : index
    %3 = vector.load %arg9[%c0, %c0_1, %c0_2] : memref<1x128x128xbf16, #tpu.memory_space<vmem>>, vector<1x128x128xbf16>
    %4 = vector.shape_cast %3 : vector<1x128x128xbf16> to vector<128x128xbf16>
    %5 = arith.index_cast %arg1 : i32 to index
    %6 = memref.load %arg10[%5] : memref<4xf32, #tpu.memory_space<smem>>
    %c0_3 = arith.constant 0 : index
    %c0_4 = arith.constant 0 : index
    %c0_5 = arith.constant 0 : index
    %7 = vector.load %arg14[%c0_3, %c0_4, %c0_5] : memref<2x128x128xbf16, #tpu.memory_space<vmem>>, vector<1x128x128xbf16>
    %8 = vector.shape_cast %7 : vector<1x128x128xbf16> to vector<128x128xbf16>
    %cst = arith.constant dense<0.000000e+00> : vector<128x128xf32>
    %9 = tpu.matmul %8, %4, %cst {dimension_numbers = #tpu.dot_dimension_numbers<[1], [0], [0], [1], [0, 0, 1, 1], [], []>} : vector<128x128xbf16>, vector<128x128xbf16>, vector<128x128xf32> -> vector<128x128xf32>
    %10 = arith.truncf %9 : vector<128x128xf32> to vector<128x128xbf16>
    %c0_6 = arith.constant 0 : index
    %c0_7 = arith.constant 0 : index
    %c0_8 = arith.constant 0 : index
    %11 = vector.load %arg15[%c0_6, %c0_7, %c0_8] : memref<2x128x128xbf16, #tpu.memory_space<vmem>>, vector<1x128x128xbf16>
    %12 = vector.shape_cast %11 : vector<1x128x128xbf16> to vector<128x128xbf16>
    %cst_9 = arith.constant dense<0.000000e+00> : vector<128x128xf32>
    %13 = tpu.matmul %10, %12, %cst_9 {dimension_numbers = #tpu.dot_dimension_numbers<[1], [0], [0], [1], [0, 0, 1, 1], [], []>} : vector<128x128xbf16>, vector<128x128xbf16>, vector<128x128xf32> -> vector<128x128xf32>
    %14 = vector.broadcast %6 : f32 to vector<128x128xf32>
    %15 = arith.addf %13, %14 : vector<128x128xf32>
    %16 = arith.truncf %15 : vector<128x128xf32> to vector<128x128xbf16>
    %c0_10 = arith.constant 0 : index
    %c0_11 = arith.constant 0 : index
    %c0_12 = arith.constant 0 : index
    %c0_13 = arith.constant 0 : index
    %17 = vector.load %arg13[%c0_10, %c0_11, %c0_12, %c0_13] : memref<2x1x128x128xbf16, #tpu.memory_space<vmem>>, vector<1x1x128x128xbf16>
    %18 = vector.shape_cast %17 : vector<1x1x128x128xbf16> to vector<128x128xbf16>
    %19 = vector.shape_cast %16 : vector<128x128xbf16> to vector<1x1x128x128xbf16>
    tpu.vector_store %arg13[%c0_10, %c0_11, %c0_12, %c0_13], %19 {strides = array<i32>} : memref<2x1x128x128xbf16, #tpu.memory_space<vmem>>, vector<1x1x128x128xbf16>,
    %c1 = arith.constant 1 : index
    %c0_14 = arith.constant 0 : index
    %c0_15 = arith.constant 0 : index
    %20 = vector.load %arg14[%c1, %c0_14, %c0_15] : memref<2x128x128xbf16, #tpu.memory_space<vmem>>, vector<1x128x128xbf16>
    %21 = vector.shape_cast %20 : vector<1x128x128xbf16> to vector<128x128xbf16>
    %cst_16 = arith.constant dense<0.000000e+00> : vector<128x128xf32>
    %22 = tpu.matmul %21, %4, %cst_16 {dimension_numbers = #tpu.dot_dimension_numbers<[1], [0], [0], [1], [0, 0, 1, 1], [], []>} : vector<128x128xbf16>, vector<128x128xbf16>, vector<128x128xf32> -> vector<128x128xf32>
    %23 = arith.truncf %22 : vector<128x128xf32> to vector<128x128xbf16>
    %c1_17 = arith.constant 1 : index
    %c0_18 = arith.constant 0 : index
    %c0_19 = arith.constant 0 : index
    %24 = vector.load %arg15[%c1_17, %c0_18, %c0_19] : memref<2x128x128xbf16, #tpu.memory_space<vmem>>, vector<1x128x128xbf16>
    %25 = vector.shape_cast %24 : vector<1x128x128xbf16> to vector<128x128xbf16>
    %cst_20 = arith.constant dense<0.000000e+00> : vector<128x128xf32>
    %26 = tpu.matmul %23, %25, %cst_20 {dimension_numbers = #tpu.dot_dimension_numbers<[1], [0], [0], [1], [0, 0, 1, 1], [], []>} : vector<128x128xbf16>, vector<128x128xbf16>, vector<128x128xf32> -> vector<128x128xf32>
    %27 = vector.broadcast %6 : f32 to vector<128x128xf32>
    %28 = arith.addf %26, %27 : vector<128x128xf32>
    %29 = arith.truncf %28 : vector<128x128xf32> to vector<128x128xbf16>
    %c1_21 = arith.constant 1 : index
    %c0_22 = arith.constant 0 : index
    %c0_23 = arith.constant 0 : index
    %c0_24 = arith.constant 0 : index
    %30 = vector.load %arg13[%c1_21, %c0_22, %c0_23, %c0_24] : memref<2x1x128x128xbf16, #tpu.memory_space<vmem>>, vector<1x1x128x128xbf16>
    %31 = vector.shape_cast %30 : vector<1x1x128x128xbf16> to vector<128x128xbf16>
    %32 = vector.shape_cast %29 : vector<128x128xbf16> to vector<1x1x128x128xbf16>
    tpu.vector_store %arg13[%c1_21, %c0_22, %c0_23, %c0_24], %32 {strides = array<i32>} : memref<2x1x128x128xbf16, #tpu.memory_space<vmem>>, vector<1x1x128x128xbf16>,
    return
  }
  func.func @transform_0(%arg0: i32, %arg1: i32) -> (i32, i32, i32) {
    %c0_i32 = arith.constant 0 : i32
    %c0_i32_0 = arith.constant 0 : i32
    %c0_i32_1 = arith.constant 0 : i32
    return %arg0, %c0_i32, %c0_i32_0 : i32, i32, i32
  }
  func.func @transform_1(%arg0: i32, %arg1: i32) -> (i32, i32) {
    %c0_i32 = arith.constant 0 : i32
    %c0_i32_0 = arith.constant 0 : i32
    %c0_i32_1 = arith.constant 0 : i32
    return %c0_i32, %c0_i32_0 : i32, i32
  }
  func.func @transform_2(%arg0: i32, %arg1: i32) -> (i32, i32) {
    %c0_i32 = arith.constant 0 : i32
    %c0_i32_0 = arith.constant 0 : i32
    %c0_i32_1 = arith.constant 0 : i32
    return %c0_i32, %c0_i32_0 : i32, i32
  }
  func.func @transform_3(%arg0: i32, %arg1: i32) -> (i32, i32) {
    %c0_i32 = arith.constant 0 : i32
    %c0_i32_0 = arith.constant 0 : i32
    %c0_i32_1 = arith.constant 0 : i32
    return %c0_i32, %c0_i32_0 : i32, i32
  }
  func.func @transform_4(%arg0: i32, %arg1: i32) -> (i32, i32) {
    %c0_i32 = arith.constant 0 : i32
    %c0_i32_0 = arith.constant 0 : i32
    %c0_i32_1 = arith.constant 0 : i32
    return %c0_i32, %c0_i32_0 : i32, i32
  }
  func.func @transform_5(%arg0: i32, %arg1: i32) -> (i32, i32) {
    %c0_i32 = arith.constant 0 : i32
    %c0_i32_0 = arith.constant 0 : i32
    %c0_i32_1 = arith.constant 0 : i32
    return %c0_i32, %c0_i32_0 : i32, i32
  }
  func.func @transform_6(%arg0: i32, %arg1: i32) -> (i32, i32) {
    %c0_i32 = arith.constant 0 : i32
    %c0_i32_0 = arith.constant 0 : i32
    %c0_i32_1 = arith.constant 0 : i32
    return %c0_i32, %c0_i32_0 : i32, i32
  }
  func.func @transform_7(%arg0: i32, %arg1: i32) -> (i32, i32, i32) {
    %c0_i32 = arith.constant 0 : i32
    %c0_i32_0 = arith.constant 0 : i32
    %c0_i32_1 = arith.constant 0 : i32
    return %arg1, %c0_i32, %c0_i32_0 : i32, i32, i32
  }
  func.func @transform_8(%arg0: i32, %arg1: i32) -> i32 {
    %c0_i32 = arith.constant 0 : i32
    %c0_i32_0 = arith.constant 0 : i32
    return %c0_i32 : i32
  }
  func.func @transform_9(%arg0: i32, %arg1: i32) -> (i32, i32, i32) {
    %c0_i32 = arith.constant 0 : i32
    %c0_i32_0 = arith.constant 0 : i32
    %c0_i32_1 = arith.constant 0 : i32
    return %arg0, %c0_i32, %c0_i32_0 : i32, i32, i32
  }
  func.func @transform_10(%arg0: i32, %arg1: i32) -> (i32, i32, i32) {
    %c0_i32 = arith.constant 0 : i32
    %c0_i32_0 = arith.constant 0 : i32
    %c0_i32_1 = arith.constant 0 : i32
    return %arg0, %c0_i32, %c0_i32_0 : i32, i32, i32
  }
  func.func @transform_11(%arg0: i32, %arg1: i32) -> (i32, i32, i32, i32) {
    %c0_i32 = arith.constant 0 : i32
    %c0_i32_0 = arith.constant 0 : i32
    %c0_i32_1 = arith.constant 0 : i32
    return %arg0, %arg1, %c0_i32, %c0_i32_0 : i32, i32, i32, i32
  }
}

</mosaic_0001>

<bundles_post_ra>
// kernel: tpu_custom_call.1
= control target key start
LH: loop header
LB: loop body
LE: loop exit
PB: predicated region body
PF: predicated region fallthrough
CT: control target
= control target key end

     0   :  { %s4759_s0 = inlined_call_operand.hbm [shape: bf16[2,128,128], index: 0, kind: input, shape index: {}]   ;;  %s4760_s1 = inlined_call_operand.hbm [shape: bf16[128,128], index: 1, kind: input, shape index: {}]   ;;  %s4761_s2 = inlined_call_operand.vmem [shape: f32[1,128], index: 2, kind: input, shape index: {}]   ;;  %s4762_s3 = inlined_call_operand.hbm [shape: bf16[128,128], index: 3, kind: input, shape index: {}]   ;;  %s4763_s4 = inlined_call_operand.vmem [shape: f32[1,128], index: 4, kind: input, shape index: {}]   ;;  %s4764_s5 = inlined_call_operand.hbm [shape: bf16[128,128], index: 5, kind: input, shape index: {}]   ;;  %s4765_s6 = inlined_call_operand.hbm [shape: bf16[128,128], index: 6, kind: input, shape index: {}]   ;;  %s4766_s7 = inlined_call_operand.hbm [shape: bf16[4,128,128], index: 7, kind: input, shape index: {}]   ;;  %s4767_s8 = inlined_call_operand.vmem [shape: f32[4], index: 8, kind: input, shape index: {}]   ;;  %s4768_s9 = inlined_call_operand.hbm [shape: f32[2,128,128], index: 9, kind: output, shape index: {0}]   ;;  %s4769_s10 = inlined_call_operand.hbm [shape: bf16[2,128,128], index: 10, kind: output, shape index: {1}]   ;;  %s4770_s11 = inlined_call_operand.hbm [shape: bf16[2,4,128,128], index: 11, kind: output, shape index: {2}]  }
   0x1   :  { %4774 = sst [smem:[#allocation31_spill]] %s4759_s0 }
   0x2   :  { %4775 = sst [smem:[#allocation32_spill]] %s4760_s1 }
   0x3   :  { %4776 = sst [smem:[#allocation33_spill]] %s4762_s3 }
   0x4   :  { %4777 = sst [smem:[#allocation34_spill]] %s4764_s5 }
   0x5   :  { %4778 = sst [smem:[#allocation35_spill]] %s4770_s11 }
   0x6   :  { %17 = vsyncpa [#allocation5], 0 }
   0x7   :  { %18 = vsyncpa [#allocation9], 0 }
   0x8   :  { %19 = vsyncpa [#allocation12], 0 }
   0x9   :  { %20 = vsyncpa [#allocation15], 0 }
   0xa   :  { %22 = vsyncpa [#allocation15 + $0x1], 0 }
   0xb   :  { %23 = vsyncpa [#allocation7], 0 }
   0xc   :  { %24 = vsyncpa [#allocation6], 0 }
   0xd   :  { %25 = vsyncpa [#allocation19], 0  ;;  %s4350_s17 = smov 0   ;;  %s4352_s18 = smov 0  }
   0xe   :  { %s4354_s19 = smov 0   ;;  %s4356_s20 = smov 0  }
   0xf   :  { %s4358_s21 = smov 0   ;;  %s4360_s22 = smov 0  }
  0x10 LB: > { %s4381_s23 = sadd.s32 4294967295, %s4267_s22   ;;  %p2736_p0 = scmp.ge.s32.totalorder %s4267_s22, 1  ;;  %s4267_s22 = sphi %s4360_s22, %s31_s22   ;;  %s4263_s21 = sphi %s4358_s21, %s4796_s21   ;;  %s4259_s20 = sphi %s4356_s20, %s4795_s20   ;;  %s4255_s19 = sphi %s4354_s19, %s4794_s19   ;;  %s4251_s18 = sphi %s4352_s18, %s4793_s18   ;;  %s4247_s17 = sphi %s4350_s17, %s4792_s17  }
  0x11   : > { %p216_p1 = scmp.eq.s32.totalorder %s4381_s23, 0  ;;  %p327_p2 = scmp.lt.s32.totalorder %s4267_s22, 5 }
  0x12   : > { %s4779_s1 = sld [smem:[#allocation32_spill]]  ;;  %s4269_s28 = smov [#allocation8]  }
  0x13   : > { %p4389_p3 = pnand %p2736_p0, %p327_p2  ;;  %s358_s29 = sshll.u32 %s4269_s28, 4  ;;  %s359_s29 = int_to_ptr.vmem [resolvable:$true] %s358_s29 }
  0x14   : > { %s4781_s5 = sld [smem:[#allocation34_spill]]  ;;  %s4270_s15 = smov [#allocation11]  }
  0x15   : > { %p3645_p4 = pneg %p4389_p3  ;;  %s392_s16 = sshll.u32 %s4270_s15, 4  ;;  %s393_s16 = int_to_ptr.vmem [resolvable:$true] %s392_s16 }
  0x16   : > { %s4771_s24 = smov 64   ;;  %s4772_s25 = smov 4  }
  0x17   : > { %p4400_p5 = pnand %p3645_p4, %p216_p1  ;;  %s4783_s0 = sld [smem:[#allocation31_spill]] }
  0x18   : > { %s356_s26 = sshll.u32 %s4779_s1, 4  ;;  %s4273_s15 = smov [#allocation4]   ;;  %s357_s26 = int_to_ptr.hbm [resolvable:$true] %s356_s26 }
  0x19   : > { %3651 = dma.hbm_to_vmem [thread:$0]  (!%p4400_p5), %s357_s26, 1024, %s359_s29, [#allocation9], %s4771_s24, %s4771_s24, %s4772_s25  }
  0x1a   : > { %s390_s13 = sshll.u32 %s4781_s5, 4  ;;  %s344_s1 = sshll.u32 %s4273_s15, 4  ;;  %s391_s13 = int_to_ptr.hbm [resolvable:$true] %s390_s13  ;;  %s345_s1 = int_to_ptr.vmem [resolvable:$true] %s344_s1 }
  0x1b   : > { %3657 = dma.hbm_to_vmem [thread:$0]  (!%p4400_p5), %s391_s13, 1024, %s393_s16, [#allocation12], %s4771_s24, %s4771_s24, %s4772_s25  }
  0x1c   : > { %s4784_s3 = sld [smem:[#allocation33_spill]]  ;;  %s4274_s29 = smov [#allocation10]  }
  0x1d   : > { %s342_s12 = sshll.u32 %s4783_s0, 4  ;;  %s375_s13 = sshll.u32 %s4274_s29, 4  ;;  %s343_s12 = int_to_ptr.hbm [resolvable:$true] %s342_s12  ;;  %s376_s13 = int_to_ptr.vmem [resolvable:$true] %s375_s13 }
  0x1e   : > { %3648 = dma.hbm_to_vmem [thread:$0]  (!%p4400_p5), %s343_s12, 2048, %s345_s1, [#allocation5], %s4771_s24, %s4771_s24, %s4772_s25  }
  0x1f   : > { %s404_s30 = sshll.u32 %s4765_s6, 4  ;;  %s419_s11 = sshll.u32 %s4767_s8, 4  ;;  %s405_s30 = int_to_ptr.hbm [resolvable:$true] %s404_s30  ;;  %s420_s11 = int_to_ptr.vmem [resolvable:$true] %s419_s11 }
  0x20   : > { %s4275_s12 = smov [#allocation13]   ;;  %s40_s29 = sadd.s32 1, %s4263_s21 }
  0x21   : > { %s406_s15 = sshll.u32 %s4275_s12, 4  ;;  %p41_p6 = scmp.ge.s32.totalorder %s40_s29, 4  ;;  %s407_s15 = int_to_ptr.vmem [resolvable:$true] %s406_s15 }
  0x22   : > { %s373_s26 = sshll.u32 %s4784_s3, 4  ;;  %s202_s16 = sadd.s32 1, %s4255_s19  ;;  %s374_s26 = int_to_ptr.hbm [resolvable:$true] %s373_s26 }
  0x23   : > { %3654 = dma.hbm_to_vmem [thread:$0]  (!%p4400_p5), %s374_s26, 1024, %s376_s13, [#allocation9], %s4771_s24, %s4771_s24, %s4772_s25  }
  0x24   : > { %3660 = dma.hbm_to_vmem [thread:$0]  (!%p4400_p5), %s405_s30, 1024, %s407_s15, [#allocation12], %s4771_s24, %s4771_s24, %s4772_s25  }
  0x25   : > { %s4276_s26 = smov [#allocation16]   ;;  %s4773_s13 = sadd.s32 4294967294, %s4267_s22  }
  0x26   : > { %3663 = dma.vmem_to_smem (!%p4400_p5), %s420_s11, 16, %s4276_s26, [#allocation7]  }
  0x27   : > { %p209_p7 = scmp.ne.s32.totalorder %s4255_s19, %s4251_s18  ;;  %s4798_s29 = smov (%p41_p6, %s40_s29), 0 }
  0x28   : > { %p210_p8 = scmp.eq.s32.totalorder %s4267_s22, 0  ;;  %p215_p9 = scmp.ne.s32.totalorder %s4251_s18, %s4247_s17 }
  0x29   : > { %s199_s28 = ssub.s32 %s4263_s21, %s4798_s29  ;;  %p314_p10 = scmp.eq.s32.totalorder %s4381_s23, 3 }
  0x2a   : > { %p200_p11 = scmp.eq.s32.totalorder %s199_s28, 0  ;;  %p4458_p12 = por %p216_p1, %p215_p9 }
  0x2b   : > { %p4464_p13 = por %p314_p10, %p209_p7  ;;  %p320_p0 = scmp.eq.s32.totalorder %s4773_s13, 3 }
  0x2c   : > { %s4471_s1 = scalar_select %p200_p11, %s4255_s19, %s202_s16  }
  0x2d   : > { %p211_p2 = por %p210_p8, %p209_p7  ;;  %p4473_p4 = por %p320_p0, %p215_p9 }
  0x2e   : > { %s430_s5 = sand.u32 1, %s4255_s19   ;;  %s3134_s11 = sshll.u32 %s4263_s21, 6 }
  0x2f   : > { %p3678_p5 = scmp.lt.s32.totalorder %s4267_s22, 4  ;;  %s2744_s12 = sshll.u32 %s430_s5, 6 }
  0x30   : > { %s439_s28 = scalar_lea.hbm %s4766_s7, %s3134_s11  ;;  %s434_s25 = scalar_lea.vmem [#allocation14], %s2744_s12 }
  0x31   : > { %s440_s24 = sshll.u32 %s439_s28, 4  ;;  %s442_s0 = sshll.u32 %s434_s25, 4  ;;  %s441_s24 = int_to_ptr.hbm [resolvable:$true] %s440_s24  ;;  %s443_s0 = int_to_ptr.vmem [resolvable:$true] %s442_s0 }
  0x32   : > { %p3665_p6 = pnand %p3678_p5, %p211_p2  ;;  %s431_s16 = scalar_lea.sflag [#allocation15], %s430_s5 }
  0x33   : > { %s4788_s13 = smov 4   ;;  %s4789_s3 = smov 64  }
  0x34   : > { %3667 = dma.hbm_to_vmem [thread:$0]  (!%p3665_p6), %s441_s24, 1024, %s443_s0, %s431_s16, %s4789_s3, %s4789_s3, %s4788_s13  }
  0x35   : > { %454 = sbr.rel (%p4389_p3) target bundleno = 1268 (0x4f4), region = 56 }
  0x3a   : > { %4214 = dma.done.wait (%p216_p1), [#allocation5], 2048  }
  0x3b   : > { %4216 = vsyncadd (%p216_p1), [#allocation5], 4294965248 }
  0x3c   : > { %4218 = dma.done.wait (%p216_p1), [#allocation9], 2048  }
  0x3d   : > { %4220 = vsyncadd (%p216_p1), [#allocation9], 4294965248 }
  0x3e   : > { %4222 = dma.done.wait (%p216_p1), [#allocation12], 2048  }
  0x3f   : > { %4224 = vsyncadd (%p216_p1), [#allocation12], 4294965248  ;;  %s481_s0 = sand.u32 1, %s4251_s18  }
  0x40   : > { %s2753_s3 = sshll.u32 %s481_s0, 6  ;;  %s482_s27 = scalar_lea.sflag [#allocation15], %s481_s0 }
  0x41   : > { %s4501_s24 = scalar_lea.vmem [#allocation14], %s2753_s3 }
  0x42   : > { %4226 = dma.done.wait (%p4458_p12), %s482_s27, 1024  }
  0x43   : > { %4228 = vsyncadd (%p4458_p12), %s482_s27, 4294966272 }
  0x44   : > { %4230 = dma.done.wait (%p216_p1), [#allocation7], 16  }
  0x45   : > { %4232 = vsyncadd (%p216_p1), [#allocation7], 4294967280 }
  0x46   : > { %496 = sfence }
  0x47   : > { %s2755_s25 = sshll.u32 %s481_s0, 7  ;;  %p2756_p3 = scmp.ne.s32.totalorder %s4259_s20, 0 }
  0x48   : > { %s4511_s13 = scalar_lea.vmem [#allocation20], %s2755_s25 }
  0x49   : > { %538 = sbr.rel (%p2756_p3) target bundleno = 823 (0x337), region = 88 }
  0x4e   : > { %v3158_v0 = vld [vmem:[#allocation8 + $0x38] sm:$0xff]  ;;  %v3157_v1 = vld [vmem:[#allocation8 + $0x30] sm:$0xff]  ;;  %v3156_v2 = vld [vmem:[#allocation8 + $0x28] sm:$0xff] }
  0x4f   : > { %735 = vmatpush.bf16.msra.mxu0 %v3158_v0  ;;  %v3155_v3 = vld [vmem:[#allocation8 + $0x20] sm:$0xff]  ;;  %v3154_v4 = vld [vmem:[#allocation8 + $0x18] sm:$0xff]  ;;  %v3153_v5 = vld [vmem:[#allocation8 + $0x10] sm:$0xff] }
  0x50   : > { %v3152_v6 = vld [vmem:[#allocation8 + $0x8] sm:$0xff]  ;;  %v3151_v7 = vld [vmem:[#allocation8] sm:$0xff]  ;;  %v3137_v10 = vld [vmem:[#allocation4 + $0x10] sm:$0xff] }
  0x51   : > { %v3135_v8 = vld [vmem:[#allocation4] sm:$0xff]  ;;  %v3136_v9 = vld [vmem:[#allocation4 + $0x8] sm:$0xff]  ;;  %v3138_v11 = vld [vmem:[#allocation4 + $0x18] sm:$0xff] }
  0x52   : > { %v3139_v12 = vld [vmem:[#allocation4 + $0x20] sm:$0xff]  ;;  %v3140_v13 = vld [vmem:[#allocation4 + $0x28] sm:$0xff]  ;;  %v3141_v14 = vld [vmem:[#allocation4 + $0x30] sm:$0xff] }
  0x53   : > { %736 = vmatpush.bf16.msra.mxu0 %v3157_v1  ;;  %v3166_v15 = vld [vmem:[#allocation10 + $0x38] sm:$0xff]  ;;  %v3165_v18 = vld [vmem:[#allocation10 + $0x30] sm:$0xff]  ;;  %v3164_v21 = vld [vmem:[#allocation10 + $0x28] sm:$0xff] }
  0x54   : > { %v3174_v16 = vld [vmem:[#allocation11 + $0x38] sm:$0xff]  ;;  %1228 = vmatpush.bf16.msra.mxu1 %v3166_v15  ;;  %v3173_v19 = vld [vmem:[#allocation11 + $0x30] sm:$0xff]  ;;  %v3172_v22 = vld [vmem:[#allocation11 + $0x28] sm:$0xff] }
  0x55   : > { %v3182_v17 = vld [vmem:[#allocation13 + $0x38] sm:$0xff]  ;;  %1445 = vmatpush.bf16.msra.mxu2 %v3174_v16  ;;  %v3181_v20 = vld [vmem:[#allocation13 + $0x30] sm:$0xff]  ;;  %v3180_v23 = vld [vmem:[#allocation13 + $0x28] sm:$0xff] }
  0x56   : > { %1598 = vmatpush.bf16.msra.mxu3 %v3182_v17  ;;  %v3163_v24 = vld [vmem:[#allocation10 + $0x20] sm:$0xff]  ;;  %v3142_v27 = vld [vmem:[#allocation4 + $0x38] sm:$0xff]  ;;  %v3161_v31 = vld [vmem:[#allocation10 + $0x10] sm:$0xff] }
  0x57   : > { %737 = vmatpush.bf16.msra.mxu0 %v3156_v2  ;;  %v3171_v25 = vld [vmem:[#allocation11 + $0x20] sm:$0xff]  ;;  %v3162_v28 = vld [vmem:[#allocation10 + $0x18] sm:$0xff]  ;;  %v3169_v32 = vld [vmem:[#allocation11 + $0x10] sm:$0xff] }
  0x58   : > { %1229 = vmatpush.bf16.msra.mxu1 %v3165_v18  ;;  %v3179_v26 = vld [vmem:[#allocation13 + $0x20] sm:$0xff]  ;;  %v3170_v29 = vld [vmem:[#allocation11 + $0x18] sm:$0xff]  ;;  %v3177_v33 = vld [vmem:[#allocation13 + $0x10] sm:$0xff] }
  0x59   : > { %1446 = vmatpush.bf16.msra.mxu2 %v3173_v19  ;;  %v3178_v30 = vld [vmem:[#allocation13 + $0x18] sm:$0xff]  ;;  %v3160_v34 = vld [vmem:[#allocation10 + $0x8] sm:$0xff]  ;;  %v4517_v37 = vld [vmem:[%s4761_s2] ss:$0 sm:$0xff] }
  0x5a   : > { %1599 = vmatpush.bf16.msra.mxu3 %v3181_v20  ;;  %v3168_v35 = vld [vmem:[#allocation11 + $0x8] sm:$0xff]  ;;  %v3159_v38 = vld [vmem:[#allocation10] sm:$0xff] }
  0x5b   : > { %738 = vmatpush.bf16.msra.mxu0 %v3155_v3  ;;  %v3176_v36 = vld [vmem:[#allocation13 + $0x8] sm:$0xff]  ;;  %v3167_v39 = vld [vmem:[#allocation11] sm:$0xff] }
  0x5c   : > { %1230 = vmatpush.bf16.msra.mxu1 %v3164_v21  ;;  %v3175_v40 = vld [vmem:[#allocation13] sm:$0xff]  ;;  %v3144_v53 = vld [vmem:[#allocation4 + $0x48] sm:$0xff] }
  0x5d   : > { %1447 = vmatpush.bf16.msra.mxu2 %v3172_v22  ;;  %v3143_v41 = vld [vmem:[#allocation4 + $0x40] sm:$0xff] }
  0x5e   : > { %1600 = vmatpush.bf16.msra.mxu3 %v3180_v23 }
  0x5f   : > { %739 = vmatpush.bf16.msra.mxu0 %v3154_v4 }
  0x60   : > { %1231 = vmatpush.bf16.msra.mxu1 %v3163_v24 }
  0x61   : > { %1448 = vmatpush.bf16.msra.mxu2 %v3171_v25 }
  0x62   : > { %1601 = vmatpush.bf16.msra.mxu3 %v3179_v26 }
  0x63   : > { %740 = vmatpush.bf16.msra.mxu0 %v3153_v5 }
  0x64   : > { %1232 = vmatpush.bf16.msra.mxu1 %v3162_v28 }
  0x65   : > { %1449 = vmatpush.bf16.msra.mxu2 %v3170_v29 }
  0x66   : > { %1602 = vmatpush.bf16.msra.mxu3 %v3178_v30 }
  0x67   : > { %741 = vmatpush.bf16.msra.mxu0 %v3152_v6 }
  0x68   : > { %1233 = vmatpush.bf16.msra.mxu1 %v3161_v31 }
  0x69   : > { %1450 = vmatpush.bf16.msra.mxu2 %v3169_v32 }
  0x6a   : > { %1603 = vmatpush.bf16.msra.mxu3 %v3177_v33 }
  0x6b   : > { %742 = vmatpush.bf16.msra.mxu0 %v3151_v7 }
  0x6c   : > { %1234 = vmatpush.bf16.msra.mxu1 %v3160_v34 }
  0x6d   : > { %1451 = vmatpush.bf16.msra.mxu2 %v3168_v35 }
  0x6e   : > { %743 = vmatmul.bf16.vlgmr.msra.gmra.mxu0 %v3135_v8  ;;  %1604 = vmatpush.bf16.msra.mxu3 %v3176_v36  ;;  %v3146_v36 = vld [vmem:[#allocation4 + $0x58] sm:$0xff] }
  0x70   : > { %1235 = vmatpush.bf16.msra.mxu1 %v3159_v38 }
  0x71   : > { %1452 = vmatpush.bf16.msra.mxu2 %v3167_v39 }
  0x72   : > { %1605 = vmatpush.bf16.msra.mxu3 %v3175_v40 }
  0x7e   : > { %748 = vmatmul.bf16.gmra.mxu0 %v3136_v9 }
  0x8e   : > { %753 = vmatmul.bf16.gmra.mxu0 %v3137_v10 }
  0x9e   : > { %758 = vmatmul.bf16.gmra.mxu0 %v3138_v11 }
  0xae   : > { %763 = vmatmul.bf16.gmra.mxu0 %v3139_v12  ;;  %v3145_v12 = vld [vmem:[#allocation4 + $0x50] sm:$0xff] }
  0xbe   : > { %768 = vmatmul.bf16.gmra.mxu0 %v3140_v13 }
  0xce   : > { %773 = vmatmul.bf16.gmra.mxu0 %v3141_v14 }
  0xde   : > { %778 = vmatmul.bf16.gmra.mxu0 %v3142_v27 }
  0xeb   : > { %v744_v42 = vpop.f32.mrf.mxu0 }
  0xec   : > { %v745_v43 = vadd.f32 %v4517_v37, %v744_v42 }
  0xee   : > { %v856_v44 = vmul.f32 0.044715, %v745_v43  ;;  %783 = vmatmul.bf16.gmra.mxu0 %v3143_v41  ;;  %v824_v61 = vmul.f32 0.5, %v745_v43 }
  0xf0   : > { %v888_v45 = vmul.f32 %v856_v44, %v745_v43 }
  0xf2   : > { %v920_v46 = vmul.f32 %v888_v45, %v745_v43 }
  0xf3   : > { %v746_v47 = vpop.f32.mrf.mxu0 }
  0xf4   : > { %v747_v48 = vadd.f32 %v4517_v37, %v746_v47  ;;  %v952_v49 = vadd.f32 %v920_v46, %v745_v43 }
  0xf6   : > { %v857_v50 = vmul.f32 0.044715, %v747_v48  ;;  %v984_v51 = vmul.f32 0.7978846, %v952_v49  ;;  %v825_v8 = vmul.f32 0.5, %v747_v48 }
  0xf8   : > { %v889_v52 = vmul.f32 %v857_v50, %v747_v48  ;;  %3873 = vtanh.f32 %v984_v51 }
  0xfa   : > { %v921_v54 = vmul.f32 %v889_v52, %v747_v48 }
  0xfb   : > { %v749_v55 = vpop.f32.mrf.mxu0 }
  0xfc   : > { %v750_v56 = vadd.f32 %v4517_v37, %v749_v55  ;;  %v953_v57 = vadd.f32 %v921_v54, %v747_v48 }
  0xfe   : > { %v3874_v58 = vpop.eup %3873  ;;  %v858_v59 = vmul.f32 0.044715, %v750_v56  ;;  %788 = vmatmul.bf16.gmra.mxu0 %v3144_v53  ;;  %v985_v60 = vmul.f32 0.7978846, %v953_v57  ;;  %v826_v21 = vmul.f32 0.5, %v750_v56 }
  0xff   : > { %v1048_v62 = vadd.f32 1.0, %v3874_v58 }
 0x100   : > { %v890_v63 = vmul.f32 %v858_v59, %v750_v56  ;;  %3875 = vtanh.f32 %v985_v60 }
 0x101   : > { %v1080_v0 = vmul.f32 %v1048_v62, %v824_v61  ;;  %v3147_v61 = vld [vmem:[#allocation4 + $0x60] sm:$0xff] }
 0x102   : > { %v922_v1 = vmul.f32 %v890_v63, %v750_v56 }
 0x103   : > { %v751_v2 = vpop.f32.mrf.mxu0  ;;  %1112 = vst [vmem:[#allocation17] sm:$0xff] %v1080_v0 }
 0x104   : > { %v752_v3 = vadd.f32 %v4517_v37, %v751_v2  ;;  %v954_v4 = vadd.f32 %v922_v1, %v750_v56 }
 0x106   : > { %v3876_v5 = vpop.eup %3875  ;;  %v859_v6 = vmul.f32 0.044715, %v752_v3  ;;  %v986_v7 = vmul.f32 0.7978846, %v954_v4  ;;  %v827_v32 = vmul.f32 0.5, %v752_v3 }
 0x107   : > { %v1049_v9 = vadd.f32 1.0, %v3876_v5 }
 0x108   : > { %v891_v10 = vmul.f32 %v859_v6, %v752_v3  ;;  %3877 = vtanh.f32 %v986_v7 }
 0x109   : > { %v1081_v11 = vmul.f32 %v1049_v9, %v825_v8 }
 0x10a   : > { %v923_v13 = vmul.f32 %v891_v10, %v752_v3 }
 0x10b   : > { %v754_v14 = vpop.f32.mrf.mxu0  ;;  %1113 = vst [vmem:[#allocation17 + $0x8] sm:$0xff] %v1081_v11  ;;  %v1144_v15 = vpack.c.bf16 %v1081_v11, %v1080_v0 }
 0x10c   : > { %v755_v16 = vadd.f32 %v4517_v37, %v754_v14  ;;  %v955_v17 = vadd.f32 %v923_v13, %v752_v3 }
 0x10d   : > { %1236 = vmatmul.bf16.vlgmr.msra.gmra.mxu1 %v1144_v15  ;;  %1453 = vmatmul.bf16.vlgmr.msra.gmra.mxu2 %v1144_v15 }
 0x10e   : > { %v3878_v18 = vpop.eup %3877  ;;  %v860_v19 = vmul.f32 0.044715, %v755_v16  ;;  %1606 = vmatmul.bf16.vlgmr.msra.gmra.mxu3 %v1144_v15  ;;  %793 = vmatmul.bf16.gmra.mxu0 %v3145_v12  ;;  %v987_v20 = vmul.f32 0.7978846, %v955_v17  ;;  %v828_v46 = vmul.f32 0.5, %v755_v16 }
 0x10f   : > { %v1050_v22 = vadd.f32 1.0, %v3878_v18 }
 0x110   : > { %v892_v23 = vmul.f32 %v860_v19, %v755_v16  ;;  %3879 = vtanh.f32 %v987_v20 }
 0x111   : > { %v1082_v24 = vmul.f32 %v1050_v22, %v826_v21  ;;  %v3148_v21 = vld [vmem:[#allocation4 + $0x68] sm:$0xff] }
 0x112   : > { %v924_v25 = vmul.f32 %v892_v23, %v755_v16 }
 0x113   : > { %v756_v26 = vpop.f32.mrf.mxu0  ;;  %1114 = vst [vmem:[#allocation17 + $0x10] sm:$0xff] %v1082_v24 }
 0x114   : > { %v757_v27 = vadd.f32 %v4517_v37, %v756_v26  ;;  %v956_v28 = vadd.f32 %v924_v25, %v755_v16 }
 0x116   : > { %v3880_v29 = vpop.eup %3879  ;;  %v861_v30 = vmul.f32 0.044715, %v757_v27  ;;  %v988_v31 = vmul.f32 0.7978846, %v956_v28  ;;  %v829_v57 = vmul.f32 0.5, %v757_v27 }
 0x117   : > { %v1051_v33 = vadd.f32 1.0, %v3880_v29 }
 0x118   : > { %v893_v34 = vmul.f32 %v861_v30, %v757_v27  ;;  %3881 = vtanh.f32 %v988_v31 }
 0x119   : > { %v1083_v35 = vmul.f32 %v1051_v33, %v827_v32 }
 0x11a   : > { %v925_v38 = vmul.f32 %v893_v34, %v757_v27 }
 0x11b   : > { %v759_v39 = vpop.f32.mrf.mxu0  ;;  %1115 = vst [vmem:[#allocation17 + $0x18] sm:$0xff] %v1083_v35  ;;  %v1145_v40 = vpack.c.bf16 %v1083_v35, %v1082_v24 }
 0x11c   : > { %v760_v41 = vadd.f32 %v4517_v37, %v759_v39  ;;  %v957_v42 = vadd.f32 %v925_v38, %v757_v27 }
 0x11d   : > { %1241 = vmatmul.bf16.gmra.mxu1 %v1145_v40  ;;  %1458 = vmatmul.bf16.gmra.mxu2 %v1145_v40 }
 0x11e   : > { %v3882_v43 = vpop.eup %3881  ;;  %v862_v44 = vmul.f32 0.044715, %v760_v41  ;;  %1611 = vmatmul.bf16.gmra.mxu3 %v1145_v40  ;;  %798 = vmatmul.bf16.gmra.mxu0 %v3146_v36  ;;  %v989_v45 = vmul.f32 0.7978846, %v957_v42  ;;  %v830_v6 = vmul.f32 0.5, %v760_v41 }
 0x11f   : > { %v1052_v47 = vadd.f32 1.0, %v3882_v43 }
 0x120   : > { %v894_v48 = vmul.f32 %v862_v44, %v760_v41  ;;  %3883 = vtanh.f32 %v989_v45 }
 0x121   : > { %v1084_v49 = vmul.f32 %v1052_v47, %v828_v46  ;;  %v3149_v46 = vld [vmem:[#allocation4 + $0x70] sm:$0xff] }
 0x122   : > { %v926_v50 = vmul.f32 %v894_v48, %v760_v41 }
 0x123   : > { %v761_v51 = vpop.f32.mrf.mxu0  ;;  %1116 = vst [vmem:[#allocation17 + $0x20] sm:$0xff] %v1084_v49 }
 0x124   : > { %v762_v52 = vadd.f32 %v4517_v37, %v761_v51  ;;  %v958_v53 = vadd.f32 %v926_v50, %v760_v41 }
 0x126   : > { %v3884_v54 = vpop.eup %3883  ;;  %v863_v55 = vmul.f32 0.044715, %v762_v52  ;;  %v990_v56 = vmul.f32 0.7978846, %v958_v53  ;;  %v831_v17 = vmul.f32 0.5, %v762_v52 }
 0x127   : > { %v1053_v58 = vadd.f32 1.0, %v3884_v54 }
 0x128   : > { %v895_v59 = vmul.f32 %v863_v55, %v762_v52  ;;  %3885 = vtanh.f32 %v990_v56 }
 0x129   : > { %v1085_v60 = vmul.f32 %v1053_v58, %v829_v57 }
 0x12a   : > { %v927_v62 = vmul.f32 %v895_v59, %v762_v52 }
 0x12b   : > { %v764_v63 = vpop.f32.mrf.mxu0  ;;  %1117 = vst [vmem:[#allocation17 + $0x28] sm:$0xff] %v1085_v60  ;;  %v1146_v0 = vpack.c.bf16 %v1085_v60, %v1084_v49 }
 0x12c   : > { %v765_v1 = vadd.f32 %v4517_v37, %v764_v63  ;;  %v959_v2 = vadd.f32 %v927_v62, %v762_v52 }
 0x12d   : > { %1246 = vmatmul.bf16.gmra.mxu1 %v1146_v0  ;;  %1463 = vmatmul.bf16.gmra.mxu2 %v1146_v0 }
 0x12e   : > { %v3886_v3 = vpop.eup %3885  ;;  %v864_v4 = vmul.f32 0.044715, %v765_v1  ;;  %1616 = vmatmul.bf16.gmra.mxu3 %v1146_v0  ;;  %803 = vmatmul.bf16.gmra.mxu0 %v3147_v61  ;;  %v991_v5 = vmul.f32 0.7978846, %v959_v2  ;;  %v832_v30 = vmul.f32 0.5, %v765_v1 }
 0x12f   : > { %v1054_v7 = vadd.f32 1.0, %v3886_v3 }
 0x130   : > { %v896_v8 = vmul.f32 %v864_v4, %v765_v1  ;;  %3887 = vtanh.f32 %v991_v5 }
 0x131   : > { %v1086_v9 = vmul.f32 %v1054_v7, %v830_v6  ;;  %v3150_v6 = vld [vmem:[#allocation4 + $0x78] sm:$0xff] }
 0x132   : > { %v928_v10 = vmul.f32 %v896_v8, %v765_v1 }
 0x133   : > { %v766_v11 = vpop.f32.mrf.mxu0  ;;  %1118 = vst [vmem:[#allocation17 + $0x30] sm:$0xff] %v1086_v9 }
 0x134   : > { %v767_v12 = vadd.f32 %v4517_v37, %v766_v11  ;;  %v960_v13 = vadd.f32 %v928_v10, %v765_v1 }
 0x136   : > { %v3888_v14 = vpop.eup %3887  ;;  %v865_v15 = vmul.f32 0.044715, %v767_v12  ;;  %v992_v16 = vmul.f32 0.7978846, %v960_v13  ;;  %v833_v42 = vmul.f32 0.5, %v767_v12 }
 0x137   : > { %v1055_v18 = vadd.f32 1.0, %v3888_v14 }
 0x138   : > { %v897_v19 = vmul.f32 %v865_v15, %v767_v12  ;;  %3889 = vtanh.f32 %v992_v16 }
 0x139   : > { %v1087_v20 = vmul.f32 %v1055_v18, %v831_v17 }
 0x13a   : > { %v929_v22 = vmul.f32 %v897_v19, %v767_v12 }
 0x13b   : > { %v769_v23 = vpop.f32.mrf.mxu0  ;;  %1119 = vst [vmem:[#allocation17 + $0x38] sm:$0xff] %v1087_v20  ;;  %v1147_v24 = vpack.c.bf16 %v1087_v20, %v1086_v9 }
 0x13c   : > { %v770_v25 = vadd.f32 %v4517_v37, %v769_v23  ;;  %v961_v26 = vadd.f32 %v929_v22, %v767_v12 }
 0x13d   : > { %1251 = vmatmul.bf16.gmra.mxu1 %v1147_v24  ;;  %1468 = vmatmul.bf16.gmra.mxu2 %v1147_v24 }
 0x13e   : > { %v3890_v27 = vpop.eup %3889  ;;  %v866_v28 = vmul.f32 0.044715, %v770_v25  ;;  %1621 = vmatmul.bf16.gmra.mxu3 %v1147_v24  ;;  %808 = vmatmul.bf16.gmra.mxu0 %v3148_v21  ;;  %v993_v29 = vmul.f32 0.7978846, %v961_v26  ;;  %v834_v55 = vmul.f32 0.5, %v770_v25 }
 0x13f   : > { %v1056_v31 = vadd.f32 1.0, %v3890_v27 }
 0x140   : > { %v898_v32 = vmul.f32 %v866_v28, %v770_v25  ;;  %3891 = vtanh.f32 %v993_v29 }
 0x141   : > { %v1088_v33 = vmul.f32 %v1056_v31, %v832_v30 }
 0x142   : > { %v930_v34 = vmul.f32 %v898_v32, %v770_v25 }
 0x143   : > { %v771_v35 = vpop.f32.mrf.mxu0  ;;  %1120 = vst [vmem:[#allocation17 + $0x40] sm:$0xff] %v1088_v33 }
 0x144   : > { %v772_v36 = vadd.f32 %v4517_v37, %v771_v35  ;;  %v962_v38 = vadd.f32 %v930_v34, %v770_v25 }
 0x146   : > { %v3892_v39 = vpop.eup %3891  ;;  %v867_v40 = vmul.f32 0.044715, %v772_v36  ;;  %v994_v41 = vmul.f32 0.7978846, %v962_v38  ;;  %v835_v2 = vmul.f32 0.5, %v772_v36 }
 0x147   : > { %v1057_v43 = vadd.f32 1.0, %v3892_v39 }
 0x148   : > { %v899_v44 = vmul.f32 %v867_v40, %v772_v36  ;;  %3893 = vtanh.f32 %v994_v41 }
 0x149   : > { %v1089_v45 = vmul.f32 %v1057_v43, %v833_v42 }
 0x14a   : > { %v931_v47 = vmul.f32 %v899_v44, %v772_v36 }
 0x14b   : > { %v774_v48 = vpop.f32.mrf.mxu0  ;;  %1121 = vst [vmem:[#allocation17 + $0x48] sm:$0xff] %v1089_v45  ;;  %v1148_v49 = vpack.c.bf16 %v1089_v45, %v1088_v33 }
 0x14c   : > { %v775_v50 = vadd.f32 %v4517_v37, %v774_v48  ;;  %v963_v51 = vadd.f32 %v931_v47, %v772_v36 }
 0x14d   : > { %1256 = vmatmul.bf16.gmra.mxu1 %v1148_v49  ;;  %1473 = vmatmul.bf16.gmra.mxu2 %v1148_v49 }
 0x14e   : > { %v3894_v52 = vpop.eup %3893  ;;  %v868_v53 = vmul.f32 0.044715, %v775_v50  ;;  %1626 = vmatmul.bf16.gmra.mxu3 %v1148_v49  ;;  %813 = vmatmul.bf16.gmra.mxu0 %v3149_v46  ;;  %v995_v54 = vmul.f32 0.7978846, %v963_v51  ;;  %v836_v15 = vmul.f32 0.5, %v775_v50 }
 0x14f   : > { %v1058_v56 = vadd.f32 1.0, %v3894_v52 }
 0x150   : > { %v900_v57 = vmul.f32 %v868_v53, %v775_v50  ;;  %3895 = vtanh.f32 %v995_v54 }
 0x151   : > { %v1090_v58 = vmul.f32 %v1058_v56, %v834_v55 }
 0x152   : > { %v932_v59 = vmul.f32 %v900_v57, %v775_v50 }
 0x153   : > { %v776_v60 = vpop.f32.mrf.mxu0  ;;  %1122 = vst [vmem:[#allocation17 + $0x50] sm:$0xff] %v1090_v58 }
 0x154   : > { %v777_v61 = vadd.f32 %v4517_v37, %v776_v60  ;;  %v964_v62 = vadd.f32 %v932_v59, %v775_v50 }
 0x156   : > { %v3896_v63 = vpop.eup %3895  ;;  %v869_v0 = vmul.f32 0.044715, %v777_v61  ;;  %v996_v1 = vmul.f32 0.7978846, %v964_v62  ;;  %v837_v26 = vmul.f32 0.5, %v777_v61 }
 0x157   : > { %v1059_v3 = vadd.f32 1.0, %v3896_v63 }
 0x158   : > { %v901_v4 = vmul.f32 %v869_v0, %v777_v61  ;;  %3897 = vtanh.f32 %v996_v1 }
 0x159   : > { %v1091_v5 = vmul.f32 %v1059_v3, %v835_v2 }
 0x15a   : > { %v933_v7 = vmul.f32 %v901_v4, %v777_v61 }
 0x15b   : > { %v779_v8 = vpop.f32.mrf.mxu0  ;;  %1123 = vst [vmem:[#allocation17 + $0x58] sm:$0xff] %v1091_v5  ;;  %v1149_v9 = vpack.c.bf16 %v1091_v5, %v1090_v58 }
 0x15c   : > { %v780_v10 = vadd.f32 %v4517_v37, %v779_v8  ;;  %v965_v11 = vadd.f32 %v933_v7, %v777_v61 }
 0x15d   : > { %1261 = vmatmul.bf16.gmra.mxu1 %v1149_v9  ;;  %1478 = vmatmul.bf16.gmra.mxu2 %v1149_v9 }
 0x15e   : > { %v3898_v12 = vpop.eup %3897  ;;  %v870_v13 = vmul.f32 0.044715, %v780_v10  ;;  %1631 = vmatmul.bf16.gmra.mxu3 %v1149_v9  ;;  %818 = vmatmul.bf16.gmra.mxu0 %v3150_v6  ;;  %v997_v14 = vmul.f32 0.7978846, %v965_v11  ;;  %v838_v39 = vmul.f32 0.5, %v780_v10 }
 0x15f   : > { %v1060_v16 = vadd.f32 1.0, %v3898_v12 }
 0x160   : > { %v902_v17 = vmul.f32 %v870_v13, %v780_v10  ;;  %3899 = vtanh.f32 %v997_v14 }
 0x161   : > { %v1092_v18 = vmul.f32 %v1060_v16, %v836_v15 }
 0x162   : > { %v934_v19 = vmul.f32 %v902_v17, %v780_v10 }
 0x163   : > { %v781_v20 = vpop.f32.mrf.mxu0  ;;  %1124 = vst [vmem:[#allocation17 + $0x60] sm:$0xff] %v1092_v18 }
 0x164   : > { %v782_v21 = vadd.f32 %v4517_v37, %v781_v20  ;;  %v966_v22 = vadd.f32 %v934_v19, %v780_v10 }
 0x166   : > { %v3900_v23 = vpop.eup %3899  ;;  %v871_v24 = vmul.f32 0.044715, %v782_v21  ;;  %v998_v25 = vmul.f32 0.7978846, %v966_v22  ;;  %v839_v50 = vmul.f32 0.5, %v782_v21 }
 0x167   : > { %v1061_v27 = vadd.f32 1.0, %v3900_v23  ;;  %v4543_v22 = vld [vmem:[%s4763_s4] ss:$0 sm:$0xff] }
 0x168   : > { %v903_v28 = vmul.f32 %v871_v24, %v782_v21  ;;  %3901 = vtanh.f32 %v998_v25 }
 0x169   : > { %v1093_v29 = vmul.f32 %v1061_v27, %v837_v26 }
 0x16a   : > { %v935_v30 = vmul.f32 %v903_v28, %v782_v21 }
 0x16b   : > { %v784_v31 = vpop.f32.mrf.mxu0  ;;  %1125 = vst [vmem:[#allocation17 + $0x68] sm:$0xff] %v1093_v29  ;;  %v1150_v32 = vpack.c.bf16 %v1093_v29, %v1092_v18 }
 0x16c   : > { %v785_v33 = vadd.f32 %v4517_v37, %v784_v31  ;;  %v967_v34 = vadd.f32 %v935_v30, %v782_v21 }
 0x16d   : > { %1266 = vmatmul.bf16.gmra.mxu1 %v1150_v32  ;;  %1483 = vmatmul.bf16.gmra.mxu2 %v1150_v32 }
 0x16e   : > { %v3902_v35 = vpop.eup %3901  ;;  %v872_v36 = vmul.f32 0.044715, %v785_v33  ;;  %1636 = vmatmul.bf16.gmra.mxu3 %v1150_v32  ;;  %v999_v38 = vmul.f32 0.7978846, %v967_v34  ;;  %v840_v62 = vmul.f32 0.5, %v785_v33 }
 0x16f   : > { %v1062_v40 = vadd.f32 1.0, %v3902_v35 }
 0x170   : > { %v904_v41 = vmul.f32 %v872_v36, %v785_v33  ;;  %3903 = vtanh.f32 %v999_v38 }
 0x171   : > { %v1094_v42 = vmul.f32 %v1062_v40, %v838_v39 }
 0x172   : > { %v936_v43 = vmul.f32 %v904_v41, %v785_v33 }
 0x173   : > { %v786_v44 = vpop.f32.mrf.mxu0  ;;  %1126 = vst [vmem:[#allocation17 + $0x70] sm:$0xff] %v1094_v42 }
 0x174   : > { %v787_v45 = vadd.f32 %v4517_v37, %v786_v44  ;;  %v968_v46 = vadd.f32 %v936_v43, %v785_v33 }
 0x176   : > { %v3904_v47 = vpop.eup %3903  ;;  %v873_v48 = vmul.f32 0.044715, %v787_v45  ;;  %v1000_v49 = vmul.f32 0.7978846, %v968_v46  ;;  %v841_v9 = vmul.f32 0.5, %v787_v45 }
 0x177   : > { %v1063_v51 = vadd.f32 1.0, %v3904_v47 }
 0x178   : > { %v905_v52 = vmul.f32 %v873_v48, %v787_v45  ;;  %3905 = vtanh.f32 %v1000_v49 }
 0x179   : > { %v1095_v53 = vmul.f32 %v1063_v51, %v839_v50 }
 0x17a   : > { %v937_v54 = vmul.f32 %v905_v52, %v787_v45 }
 0x17b   : > { %v789_v55 = vpop.f32.mrf.mxu0  ;;  %1127 = vst [vmem:[#allocation17 + $0x78] sm:$0xff] %v1095_v53  ;;  %v1151_v56 = vpack.c.bf16 %v1095_v53, %v1094_v42 }
 0x17c   : > { %v790_v57 = vadd.f32 %v4517_v37, %v789_v55  ;;  %v969_v58 = vadd.f32 %v937_v54, %v787_v45 }
 0x17d   : > { %1271 = vmatmul.bf16.gmra.mxu1 %v1151_v56  ;;  %1488 = vmatmul.bf16.gmra.mxu2 %v1151_v56 }
 0x17e   : > { %v3906_v59 = vpop.eup %3905  ;;  %v874_v60 = vmul.f32 0.044715, %v790_v57  ;;  %1641 = vmatmul.bf16.gmra.mxu3 %v1151_v56  ;;  %v1001_v61 = vmul.f32 0.7978846, %v969_v58  ;;  %v842_v23 = vmul.f32 0.5, %v790_v57 }
 0x17f   : > { %v1064_v63 = vadd.f32 1.0, %v3906_v59 }
 0x180   : > { %v906_v0 = vmul.f32 %v874_v60, %v790_v57  ;;  %3907 = vtanh.f32 %v1001_v61 }
 0x181   : > { %v1096_v1 = vmul.f32 %v1064_v63, %v840_v62 }
 0x182   : > { %v938_v2 = vmul.f32 %v906_v0, %v790_v57 }
 0x183   : > { %v791_v3 = vpop.f32.mrf.mxu0  ;;  %1128 = vst [vmem:[#allocation17 + $0x80] sm:$0xff] %v1096_v1 }
 0x184   : > { %v792_v4 = vadd.f32 %v4517_v37, %v791_v3  ;;  %v970_v5 = vadd.f32 %v938_v2, %v790_v57 }
 0x186   : > { %v3908_v6 = vpop.eup %3907  ;;  %v875_v7 = vmul.f32 0.044715, %v792_v4  ;;  %v1002_v8 = vmul.f32 0.7978846, %v970_v5  ;;  %v843_v41 = vmul.f32 0.5, %v792_v4 }
 0x187   : > { %v1065_v10 = vadd.f32 1.0, %v3908_v6 }
 0x188   : > { %v907_v11 = vmul.f32 %v875_v7, %v792_v4  ;;  %3909 = vtanh.f32 %v1002_v8 }
 0x189   : > { %v1097_v12 = vmul.f32 %v1065_v10, %v841_v9 }
 0x18a   : > { %v1237_v13 = vpop.f32.mrf.mxu1  ;;  %v939_v14 = vmul.f32 %v907_v11, %v792_v4 }
 0x18b   : > { %v794_v15 = vpop.f32.mrf.mxu0  ;;  %1129 = vst [vmem:[#allocation17 + $0x88] sm:$0xff] %v1097_v12  ;;  %v1152_v16 = vpack.c.bf16 %v1097_v12, %v1096_v1  ;;  %v1238_v31 = vadd.f32 %v4543_v22, %v1237_v13 }
 0x18c   : > { %v795_v17 = vadd.f32 %v4517_v37, %v794_v15  ;;  %v971_v18 = vadd.f32 %v939_v14, %v792_v4 }
 0x18d   : > { %1276 = vmatmul.bf16.gmra.mxu1 %v1152_v16  ;;  %1493 = vmatmul.bf16.gmra.mxu2 %v1152_v16 }
 0x18e   : > { %v3910_v19 = vpop.eup %3909  ;;  %v876_v20 = vmul.f32 0.044715, %v795_v17  ;;  %1646 = vmatmul.bf16.gmra.mxu3 %v1152_v16  ;;  %v1003_v21 = vmul.f32 0.7978846, %v971_v18  ;;  %v844_v57 = vmul.f32 0.5, %v795_v17 }
 0x18f   : > { %v1066_v24 = vadd.f32 1.0, %v3910_v19 }
 0x190   : > { %v908_v25 = vmul.f32 %v876_v20, %v795_v17  ;;  %v1454_v26 = vpop.f32.mrf.mxu2  ;;  %3911 = vtanh.f32 %v1003_v21 }
 0x191   : > { %v4545_v27 = vpop.f32.mrf.mxu3  ;;  %v1098_v28 = vmul.f32 %v1066_v24, %v842_v23 }
 0x192   : > { %v1239_v29 = vpop.f32.mrf.mxu1  ;;  %v940_v30 = vmul.f32 %v908_v25, %v795_v17 }
 0x193   : > { %v1240_v32 = vadd.f32 %v4543_v22, %v1239_v29  ;;  %v796_v33 = vpop.f32.mrf.mxu0  ;;  %1130 = vst [vmem:[#allocation17 + $0x90] sm:$0xff] %v1098_v28 }
 0x194   : > { %v797_v34 = vadd.f32 %v4517_v37, %v796_v33  ;;  %v972_v35 = vadd.f32 %v940_v30, %v795_v17 }
 0x195   : > { %v3227_v36 = vpack.c.bf16 %v1240_v32, %v1238_v31 }
 0x196   : > { %v3912_v38 = vpop.eup %3911  ;;  %v877_v39 = vmul.f32 0.044715, %v797_v34  ;;  %v1004_v40 = vmul.f32 0.7978846, %v972_v35  ;;  %v845_v10 = vmul.f32 0.5, %v797_v34 }
 0x197   : > { %3228 = vst [vmem:[#allocation18] sm:$0xff] %v3227_v36   ;;  %v1067_v42 = vadd.f32 1.0, %v3912_v38 }
 0x198   : > { %v909_v43 = vmul.f32 %v877_v39, %v797_v34  ;;  %v1456_v44 = vpop.f32.mrf.mxu2  ;;  %3913 = vtanh.f32 %v1004_v40 }
 0x199   : > { %v3307_v45 = vpack.c.bf16 %v1456_v44, %v1454_v26  ;;  %v4550_v46 = vpop.f32.mrf.mxu3  ;;  %v1099_v47 = vmul.f32 %v1067_v42, %v843_v41 }
 0x19a   : > { %v1242_v48 = vpop.f32.mrf.mxu1  ;;  %v941_v49 = vmul.f32 %v909_v43, %v797_v34 }
 0x19b   : > { %3308 = vst [vmem:[#allocation2 + $0x30] sm:$0xff] %v3307_v45   ;;  %v799_v50 = vpop.f32.mrf.mxu0  ;;  %v1153_v51 = vpack.c.bf16 %v1099_v47, %v1098_v28  ;;  %v1243_v1 = vadd.f32 %v4543_v22, %v1242_v48 }
 0x19c   : > { %v800_v52 = vadd.f32 %v4517_v37, %v799_v50  ;;  %1131 = vst [vmem:[#allocation17 + $0x98] sm:$0xff] %v1099_v47  ;;  %v973_v53 = vadd.f32 %v941_v49, %v797_v34 }
 0x19d   : > { %1281 = vmatmul.bf16.gmra.mxu1 %v1153_v51  ;;  %1498 = vmatmul.bf16.gmra.mxu2 %v1153_v51 }
 0x19e   : > { %v3914_v54 = vpop.eup %3913  ;;  %v878_v55 = vmul.f32 0.044715, %v800_v52  ;;  %1651 = vmatmul.bf16.gmra.mxu3 %v1153_v51  ;;  %v1005_v56 = vmul.f32 0.7978846, %v973_v53  ;;  %v846_v28 = vmul.f32 0.5, %v800_v52 }
 0x19f   : > { %v1068_v58 = vadd.f32 1.0, %v3914_v54 }
 0x1a0   : > { %v910_v59 = vmul.f32 %v878_v55, %v800_v52  ;;  %v1459_v60 = vpop.f32.mrf.mxu2  ;;  %3915 = vtanh.f32 %v1005_v56 }
 0x1a1   : > { %v4553_v61 = vpop.f32.mrf.mxu3  ;;  %v1100_v62 = vmul.f32 %v1068_v58, %v844_v57 }
 0x1a2   : > { %v1244_v63 = vpop.f32.mrf.mxu1  ;;  %v942_v0 = vmul.f32 %v910_v59, %v800_v52 }
 0x1a3   : > { %v1245_v2 = vadd.f32 %v4543_v22, %v1244_v63  ;;  %v801_v3 = vpop.f32.mrf.mxu0  ;;  %1132 = vst [vmem:[#allocation17 + $0xa0] sm:$0xff] %v1100_v62 }
 0x1a4   : > { %v802_v4 = vadd.f32 %v4517_v37, %v801_v3  ;;  %v974_v5 = vadd.f32 %v942_v0, %v800_v52 }
 0x1a5   : > { %v3232_v6 = vpack.c.bf16 %v1245_v2, %v1243_v1 }
 0x1a6   : > { %v3916_v7 = vpop.eup %3915  ;;  %v879_v8 = vmul.f32 0.044715, %v802_v4  ;;  %v1006_v9 = vmul.f32 0.7978846, %v974_v5  ;;  %v847_v47 = vmul.f32 0.5, %v802_v4 }
 0x1a7   : > { %3544 = vst [vmem:[#allocation18 + $0x8] sm:$0xff] %v3232_v6   ;;  %v1069_v11 = vadd.f32 1.0, %v3916_v7 }
 0x1a8   : > { %v911_v12 = vmul.f32 %v879_v8, %v802_v4  ;;  %v1461_v13 = vpop.f32.mrf.mxu2  ;;  %3917 = vtanh.f32 %v1006_v9 }
 0x1a9   : > { %v3312_v14 = vpack.c.bf16 %v1461_v13, %v1459_v60  ;;  %v4558_v15 = vpop.f32.mrf.mxu3  ;;  %v1101_v16 = vmul.f32 %v1069_v11, %v845_v10 }
 0x1aa   : > { %v1247_v17 = vpop.f32.mrf.mxu1  ;;  %v943_v18 = vmul.f32 %v911_v12, %v802_v4 }
 0x1ab   : > { %3559 = vst [vmem:[#allocation2] sm:$0xff] %v3312_v14   ;;  %v804_v19 = vpop.f32.mrf.mxu0  ;;  %v1154_v20 = vpack.c.bf16 %v1101_v16, %v1100_v62  ;;  %v1248_v36 = vadd.f32 %v4543_v22, %v1247_v17 }
 0x1ac   : > { %v805_v21 = vadd.f32 %v4517_v37, %v804_v19  ;;  %1133 = vst [vmem:[#allocation17 + $0xa8] sm:$0xff] %v1101_v16  ;;  %v975_v23 = vadd.f32 %v943_v18, %v802_v4 }
 0x1ad   : > { %1286 = vmatmul.bf16.gmra.mxu1 %v1154_v20  ;;  %1503 = vmatmul.bf16.gmra.mxu2 %v1154_v20 }
 0x1ae   : > { %v3918_v24 = vpop.eup %3917  ;;  %v880_v25 = vmul.f32 0.044715, %v805_v21  ;;  %1656 = vmatmul.bf16.gmra.mxu3 %v1154_v20  ;;  %v1007_v26 = vmul.f32 0.7978846, %v975_v23  ;;  %v848_v0 = vmul.f32 0.5, %v805_v21 }
 0x1af   : > { %v1070_v29 = vadd.f32 1.0, %v3918_v24 }
 0x1b0   : > { %v912_v30 = vmul.f32 %v880_v25, %v805_v21  ;;  %v1464_v31 = vpop.f32.mrf.mxu2  ;;  %3919 = vtanh.f32 %v1007_v26 }
 0x1b1   : > { %v4561_v32 = vpop.f32.mrf.mxu3  ;;  %v1102_v33 = vmul.f32 %v1070_v29, %v846_v28 }
 0x1b2   : > { %v1249_v34 = vpop.f32.mrf.mxu1  ;;  %v944_v35 = vmul.f32 %v912_v30, %v805_v21 }
 0x1b3   : > { %v1250_v38 = vadd.f32 %v4543_v22, %v1249_v34  ;;  %v806_v39 = vpop.f32.mrf.mxu0  ;;  %1134 = vst [vmem:[#allocation17 + $0xb0] sm:$0xff] %v1102_v33 }
 0x1b4   : > { %v807_v40 = vadd.f32 %v4517_v37, %v806_v39  ;;  %v976_v41 = vadd.f32 %v944_v35, %v805_v21 }
 0x1b5   : > { %v3237_v42 = vpack.c.bf16 %v1250_v38, %v1248_v36 }
 0x1b6   : > { %v3920_v43 = vpop.eup %3919  ;;  %v881_v44 = vmul.f32 0.044715, %v807_v40  ;;  %v1008_v45 = vmul.f32 0.7978846, %v976_v41  ;;  %v849_v18 = vmul.f32 0.5, %v807_v40 }
 0x1b7   : > { %3545 = vst [vmem:[#allocation18 + $0x10] sm:$0xff] %v3237_v42   ;;  %v1071_v48 = vadd.f32 1.0, %v3920_v43 }
 0x1b8   : > { %v913_v49 = vmul.f32 %v881_v44, %v807_v40  ;;  %v1466_v50 = vpop.f32.mrf.mxu2  ;;  %3921 = vtanh.f32 %v1008_v45 }
 0x1b9   : > { %v3317_v51 = vpack.c.bf16 %v1466_v50, %v1464_v31  ;;  %v4566_v52 = vpop.f32.mrf.mxu3  ;;  %v1103_v53 = vmul.f32 %v1071_v48, %v847_v47 }
 0x1ba   : > { %v1252_v54 = vpop.f32.mrf.mxu1  ;;  %v945_v55 = vmul.f32 %v913_v49, %v807_v40 }
 0x1bb   : > { %3560 = vst [vmem:[#allocation2 + $0x58] sm:$0xff] %v3317_v51   ;;  %v809_v56 = vpop.f32.mrf.mxu0  ;;  %v1155_v57 = vpack.c.bf16 %v1103_v53, %v1102_v33  ;;  %v1253_v8 = vadd.f32 %v4543_v22, %v1252_v54 }
 0x1bc   : > { %v810_v58 = vadd.f32 %v4517_v37, %v809_v56  ;;  %1135 = vst [vmem:[#allocation17 + $0xb8] sm:$0xff] %v1103_v53  ;;  %v977_v59 = vadd.f32 %v945_v55, %v807_v40 }
 0x1bd   : > { %1291 = vmatmul.bf16.gmra.mxu1 %v1155_v57  ;;  %1508 = vmatmul.bf16.gmra.mxu2 %v1155_v57 }
 0x1be   : > { %v3922_v60 = vpop.eup %3921  ;;  %v882_v62 = vmul.f32 0.044715, %v810_v58  ;;  %1661 = vmatmul.bf16.gmra.mxu3 %v1155_v57  ;;  %v1009_v63 = vmul.f32 0.7978846, %v977_v59  ;;  %v850_v38 = vmul.f32 0.5, %v810_v58 }
 0x1bf   : > { %v1072_v1 = vadd.f32 1.0, %v3922_v60 }
 0x1c0   : > { %v914_v2 = vmul.f32 %v882_v62, %v810_v58  ;;  %v1469_v3 = vpop.f32.mrf.mxu2  ;;  %3923 = vtanh.f32 %v1009_v63 }
 0x1c1   : > { %v4569_v4 = vpop.f32.mrf.mxu3  ;;  %v1104_v5 = vmul.f32 %v1072_v1, %v848_v0 }
 0x1c2   : > { %v1254_v6 = vpop.f32.mrf.mxu1  ;;  %v946_v7 = vmul.f32 %v914_v2, %v810_v58 }
 0x1c3   : > { %v1255_v9 = vadd.f32 %v4543_v22, %v1254_v6  ;;  %v811_v10 = vpop.f32.mrf.mxu0  ;;  %1136 = vst [vmem:[#allocation17 + $0xc0] sm:$0xff] %v1104_v5 }
 0x1c4   : > { %v812_v11 = vadd.f32 %v4517_v37, %v811_v10  ;;  %v978_v12 = vadd.f32 %v946_v7, %v810_v58 }
 0x1c5   : > { %v3242_v13 = vpack.c.bf16 %v1255_v9, %v1253_v8 }
 0x1c6   : > { %v3924_v14 = vpop.eup %3923  ;;  %v883_v16 = vmul.f32 0.044715, %v812_v11  ;;  %v1010_v17 = vmul.f32 0.7978846, %v978_v12  ;;  %v851_v57 = vmul.f32 0.5, %v812_v11 }
 0x1c7   : > { %3546 = vst [vmem:[#allocation18 + $0x18] sm:$0xff] %v3242_v13   ;;  %v1073_v19 = vadd.f32 1.0, %v3924_v14 }
 0x1c8   : > { %v915_v20 = vmul.f32 %v883_v16, %v812_v11  ;;  %v1471_v21 = vpop.f32.mrf.mxu2  ;;  %3925 = vtanh.f32 %v1010_v17 }
 0x1c9   : > { %v3322_v23 = vpack.c.bf16 %v1471_v21, %v1469_v3  ;;  %v4574_v24 = vpop.f32.mrf.mxu3  ;;  %v1105_v25 = vmul.f32 %v1073_v19, %v849_v18 }
 0x1ca   : > { %v1257_v26 = vpop.f32.mrf.mxu1  ;;  %v947_v28 = vmul.f32 %v915_v20, %v812_v11 }
 0x1cb   : > { %3561 = vst [vmem:[#allocation2 + $0x18] sm:$0xff] %v3322_v23   ;;  %v814_v29 = vpop.f32.mrf.mxu0  ;;  %v1156_v30 = vpack.c.bf16 %v1105_v25, %v1104_v5  ;;  %v1258_v47 = vadd.f32 %v4543_v22, %v1257_v26  ;;  %v3937_v5 = vld [vmem:[%s4761_s2] ss:$0 sm:$0xff] }
 0x1cc   : > { %v815_v31 = vadd.f32 %v4517_v37, %v814_v29  ;;  %1137 = vst [vmem:[#allocation17 + $0xc8] sm:$0xff] %v1105_v25  ;;  %v979_v33 = vadd.f32 %v947_v28, %v812_v11 }
 0x1cd   : > { %1296 = vmatmul.bf16.gmra.mxu1 %v1156_v30  ;;  %1513 = vmatmul.bf16.gmra.mxu2 %v1156_v30 }
 0x1ce   : > { %v3926_v34 = vpop.eup %3925  ;;  %v884_v35 = vmul.f32 0.044715, %v815_v31  ;;  %1666 = vmatmul.bf16.gmra.mxu3 %v1156_v30  ;;  %v1011_v36 = vmul.f32 0.7978846, %v979_v33  ;;  %v852_v11 = vmul.f32 0.5, %v815_v31 }
 0x1cf   : > { %v1074_v39 = vadd.f32 1.0, %v3926_v34 }
 0x1d0   : > { %v916_v40 = vmul.f32 %v884_v35, %v815_v31  ;;  %v1474_v41 = vpop.f32.mrf.mxu2  ;;  %3927 = vtanh.f32 %v1011_v36 }
 0x1d1   : > { %v4577_v42 = vpop.f32.mrf.mxu3  ;;  %v1106_v43 = vmul.f32 %v1074_v39, %v850_v38 }
 0x1d2   : > { %v1259_v44 = vpop.f32.mrf.mxu1  ;;  %v948_v45 = vmul.f32 %v916_v40, %v815_v31 }
 0x1d3   : > { %v1260_v48 = vadd.f32 %v4543_v22, %v1259_v44  ;;  %v816_v49 = vpop.f32.mrf.mxu0  ;;  %1138 = vst [vmem:[#allocation17 + $0xd0] sm:$0xff] %v1106_v43 }
 0x1d4   : > { %v817_v50 = vadd.f32 %v4517_v37, %v816_v49  ;;  %v980_v51 = vadd.f32 %v948_v45, %v815_v31 }
 0x1d5   : > { %v3247_v53 = vpack.c.bf16 %v1260_v48, %v1258_v47 }
 0x1d6   : > { %v3928_v54 = vpop.eup %3927  ;;  %v885_v55 = vmul.f32 0.044715, %v817_v50  ;;  %v1012_v56 = vmul.f32 0.7978846, %v980_v51  ;;  %v853_v33 = vmul.f32 0.5, %v817_v50 }
 0x1d7   : > { %3547 = vst [vmem:[#allocation18 + $0x20] sm:$0xff] %v3247_v53   ;;  %v1075_v58 = vadd.f32 1.0, %v3928_v54 }
 0x1d8   : > { %v917_v59 = vmul.f32 %v885_v55, %v817_v50  ;;  %v1476_v60 = vpop.f32.mrf.mxu2  ;;  %3929 = vtanh.f32 %v1012_v56 }
 0x1d9   : > { %v3327_v62 = vpack.c.bf16 %v1476_v60, %v1474_v41  ;;  %v4582_v63 = vpop.f32.mrf.mxu3  ;;  %v1107_v0 = vmul.f32 %v1075_v58, %v851_v57 }
 0x1da   : > { %v1262_v1 = vpop.f32.mrf.mxu1  ;;  %v949_v2 = vmul.f32 %v917_v59, %v817_v50 }
 0x1db   : > { %3562 = vst [vmem:[#allocation2 + $0x50] sm:$0xff] %v3327_v62   ;;  %v819_v3 = vpop.f32.mrf.mxu0  ;;  %v1157_v37 = vpack.c.bf16 %v1107_v0, %v1106_v43  ;;  %v1263_v20 = vadd.f32 %v4543_v22, %v1262_v1 }
 0x1dc   : > { %v820_v6 = vadd.f32 %v3937_v5, %v819_v3  ;;  %1139 = vst [vmem:[#allocation17 + $0xd8] sm:$0xff] %v1107_v0  ;;  %v981_v7 = vadd.f32 %v949_v2, %v817_v50 }
 0x1dd   : > { %1301 = vmatmul.bf16.gmra.mxu1 %v1157_v37  ;;  %1518 = vmatmul.bf16.gmra.mxu2 %v1157_v37 }
 0x1de   : > { %v3930_v8 = vpop.eup %3929  ;;  %v886_v9 = vmul.f32 0.044715, %v820_v6  ;;  %1671 = vmatmul.bf16.gmra.mxu3 %v1157_v37  ;;  %v1013_v10 = vmul.f32 0.7978846, %v981_v7  ;;  %v854_v49 = vmul.f32 0.5, %v820_v6 }
 0x1df   : > { %v1076_v12 = vadd.f32 1.0, %v3930_v8 }
 0x1e0   : > { %v918_v13 = vmul.f32 %v886_v9, %v820_v6  ;;  %v1479_v14 = vpop.f32.mrf.mxu2  ;;  %3931 = vtanh.f32 %v1013_v10 }
 0x1e1   : > { %v4587_v16 = vpop.f32.mrf.mxu3  ;;  %v1108_v17 = vmul.f32 %v1076_v12, %v852_v11 }
 0x1e2   : > { %v1264_v18 = vpop.f32.mrf.mxu1  ;;  %v950_v19 = vmul.f32 %v918_v13, %v820_v6 }
 0x1e3   : > { %v1265_v21 = vadd.f32 %v4543_v22, %v1264_v18  ;;  %v821_v23 = vpop.f32.mrf.mxu0  ;;  %1140 = vst [vmem:[#allocation17 + $0xe0] sm:$0xff] %v1108_v17 }
 0x1e4   : > { %v822_v25 = vadd.f32 %v3937_v5, %v821_v23  ;;  %v982_v26 = vadd.f32 %v950_v19, %v820_v6 }
 0x1e5   : > { %v3252_v28 = vpack.c.bf16 %v1265_v21, %v1263_v20 }
 0x1e6   : > { %v3932_v29 = vpop.eup %3931  ;;  %v887_v30 = vmul.f32 0.044715, %v822_v25  ;;  %v1014_v31 = vmul.f32 0.7978846, %v982_v26  ;;  %v855_v60 = vmul.f32 0.5, %v822_v25 }
 0x1e7   : > { %3548 = vst [vmem:[#allocation18 + $0x28] sm:$0xff] %v3252_v28   ;;  %v1077_v34 = vadd.f32 1.0, %v3932_v29 }
 0x1e8   : > { %v919_v35 = vmul.f32 %v887_v30, %v822_v25  ;;  %v1481_v36 = vpop.f32.mrf.mxu2  ;;  %3933 = vtanh.f32 %v1014_v31 }
 0x1e9   : > { %v3332_v38 = vpack.c.bf16 %v1481_v36, %v1479_v14  ;;  %v4591_v39 = vpop.f32.mrf.mxu3  ;;  %v1109_v40 = vmul.f32 %v1077_v34, %v853_v33 }
 0x1ea   : > { %v1267_v41 = vpop.f32.mrf.mxu1  ;;  %v951_v43 = vmul.f32 %v919_v35, %v822_v25 }
 0x1eb   : > { %3563 = vst [vmem:[#allocation2 + $0x68] sm:$0xff] %v3332_v38   ;;  %v1158_v44 = vpack.c.bf16 %v1109_v40, %v1108_v17  ;;  %v1268_v56 = vadd.f32 %v4543_v22, %v1267_v41 }
 0x1ec   : > { %1141 = vst [vmem:[#allocation17 + $0xe8] sm:$0xff] %v1109_v40  ;;  %v983_v45 = vadd.f32 %v951_v43, %v822_v25 }
 0x1ed   : > { %1306 = vmatmul.bf16.gmra.mxu1 %v1158_v44  ;;  %1523 = vmatmul.bf16.gmra.mxu2 %v1158_v44 }
 0x1ee   : > { %v3934_v47 = vpop.eup %3933  ;;  %1676 = vmatmul.bf16.gmra.mxu3 %v1158_v44  ;;  %v1015_v48 = vmul.f32 0.7978846, %v983_v45 }
 0x1ef   : > { %v1078_v50 = vadd.f32 1.0, %v3934_v47 }
 0x1f0   : > { %v1484_v51 = vpop.f32.mrf.mxu2  ;;  %3935 = vtanh.f32 %v1015_v48 }
 0x1f1   : > { %v4593_v53 = vpop.f32.mrf.mxu3  ;;  %v1110_v54 = vmul.f32 %v1078_v50, %v854_v49 }
 0x1f2   : > { %v1269_v55 = vpop.f32.mrf.mxu1 }
 0x1f3   : > { %v1270_v57 = vadd.f32 %v4543_v22, %v1269_v55  ;;  %1142 = vst [vmem:[#allocation17 + $0xf0] sm:$0xff] %v1110_v54 }
 0x1f5   : > { %v3257_v58 = vpack.c.bf16 %v1270_v57, %v1268_v56 }
 0x1f6   : > { %v3936_v59 = vpop.eup %3935 }
 0x1f7   : > { %3549 = vst [vmem:[#allocation18 + $0x30] sm:$0xff] %v3257_v58   ;;  %v1079_v62 = vadd.f32 1.0, %v3936_v59 }
 0x1f8   : > { %v1486_v0 = vpop.f32.mrf.mxu2 }
 0x1f9   : > { %v3337_v1 = vpack.c.bf16 %v1486_v0, %v1484_v51  ;;  %v4597_v2 = vpop.f32.mrf.mxu3  ;;  %v1111_v3 = vmul.f32 %v1079_v62, %v855_v60 }
 0x1fa   : > { %v1272_v37 = vpop.f32.mrf.mxu1 }
 0x1fb   : > { %3564 = vst [vmem:[#allocation2 + $0x8] sm:$0xff] %v3337_v1   ;;  %v1159_v5 = vpack.c.bf16 %v1111_v3, %v1110_v54  ;;  %v1273_v9 = vadd.f32 %v4543_v22, %v1272_v37 }
 0x1fc   : > { %1143 = vst [vmem:[#allocation17 + $0xf8] sm:$0xff] %v1111_v3 }
 0x1fd   : > { %1311 = vmatmul.bf16.gmra.mxu1 %v1159_v5  ;;  %1528 = vmatmul.bf16.gmra.mxu2 %v1159_v5 }
 0x1fe   : > { %1681 = vmatmul.bf16.gmra.mxu3 %v1159_v5 }
 0x200   : > { %v1489_v6 = vpop.f32.mrf.mxu2 }
 0x201   : > { %v4599_v7 = vpop.f32.mrf.mxu3 }
 0x202   : > { %v1274_v8 = vpop.f32.mrf.mxu1 }
 0x203   : > { %v1275_v10 = vadd.f32 %v4543_v22, %v1274_v8 }
 0x205   : > { %v3262_v11 = vpack.c.bf16 %v1275_v10, %v1273_v9 }
 0x207   : > { %3550 = vst [vmem:[#allocation18 + $0x38] sm:$0xff] %v3262_v11  }
 0x208   : > { %v1491_v12 = vpop.f32.mrf.mxu2 }
 0x209   : > { %v3342_v13 = vpack.c.bf16 %v1491_v12, %v1489_v6  ;;  %v4603_v14 = vpop.f32.mrf.mxu3 }
 0x20a   : > { %v1277_v17 = vpop.f32.mrf.mxu1 }
 0x20b   : > { %3565 = vst [vmem:[#allocation2 + $0x48] sm:$0xff] %v3342_v13   ;;  %v1278_v23 = vadd.f32 %v4543_v22, %v1277_v17 }
 0x210   : > { %v1494_v18 = vpop.f32.mrf.mxu2 }
 0x211   : > { %v1647_v19 = vpop.f32.mrf.mxu3 }
 0x212   : > { %v1279_v20 = vpop.f32.mrf.mxu1  ;;  %v3759_v21 = vpack.i.bf16 %v1647_v19, %v4545_v27 }
 0x213   : > { %v1280_v25 = vadd.f32 %v4543_v22, %v1279_v20 }
 0x214   : > { %3760 = vxpose.xlu0.b32.start [1/16] %v3759_v21, 128 }
 0x215   : > { %v3267_v26 = vpack.c.bf16 %v1280_v25, %v1278_v23 }
 0x217   : > { %3551 = vst [vmem:[#allocation18 + $0x40] sm:$0xff] %v3267_v26  }
 0x218   : > { %v1496_v28 = vpop.f32.mrf.mxu2 }
 0x219   : > { %v3347_v29 = vpack.c.bf16 %v1496_v28, %v1494_v18  ;;  %v1649_v30 = vpop.f32.mrf.mxu3 }
 0x21a   : > { %v3761_v31 = vpack.i.bf16 %v1649_v30, %v4550_v46  ;;  %v1282_v33 = vpop.f32.mrf.mxu1 }
 0x21b   : > { %3566 = vst [vmem:[#allocation2 + $0x40] sm:$0xff] %v3347_v29   ;;  %v1283_v38 = vadd.f32 %v4543_v22, %v1282_v33 }
 0x21c   : > { %3762 = vxpose.xlu0.b32.cont [2/16] %v3761_v31, 128 }
 0x220   : > { %v1499_v34 = vpop.f32.mrf.mxu2 }
 0x221   : > { %v1652_v35 = vpop.f32.mrf.mxu3 }
 0x222   : > { %v3763_v36 = vpack.i.bf16 %v1652_v35, %v4553_v61  ;;  %v1284_v27 = vpop.f32.mrf.mxu1 }
 0x223   : > { %v1285_v40 = vadd.f32 %v4543_v22, %v1284_v27 }
 0x224   : > { %3764 = vxpose.xlu0.b32.cont [3/16] %v3763_v36, 128 }
 0x225   : > { %v3272_v41 = vpack.c.bf16 %v1285_v40, %v1283_v38 }
 0x227   : > { %3552 = vst [vmem:[#allocation18 + $0x48] sm:$0xff] %v3272_v41  }
 0x228   : > { %v1501_v43 = vpop.f32.mrf.mxu2 }
 0x229   : > { %v3352_v44 = vpack.c.bf16 %v1501_v43, %v1499_v34  ;;  %v1654_v45 = vpop.f32.mrf.mxu3 }
 0x22a   : > { %v3765_v46 = vpack.i.bf16 %v1654_v45, %v4558_v15  ;;  %v1287_v47 = vpop.f32.mrf.mxu1 }
 0x22b   : > { %3567 = vst [vmem:[#allocation2 + $0x20] sm:$0xff] %v3352_v44   ;;  %v1288_v51 = vadd.f32 %v4543_v22, %v1287_v47 }
 0x22c   : > { %3766 = vxpose.xlu0.b32.cont [4/16] %v3765_v46, 128 }
 0x230   : > { %v1504_v48 = vpop.f32.mrf.mxu2 }
 0x231   : > { %v1657_v49 = vpop.f32.mrf.mxu3 }
 0x232   : > { %v3767_v61 = vpack.i.bf16 %v1657_v49, %v4561_v32  ;;  %v1289_v50 = vpop.f32.mrf.mxu1 }
 0x233   : > { %v1290_v54 = vadd.f32 %v4543_v22, %v1289_v50 }
 0x234   : > { %3768 = vxpose.xlu0.b32.cont [5/16] %v3767_v61, 128 }
 0x235   : > { %v3277_v55 = vpack.c.bf16 %v1290_v54, %v1288_v51 }
 0x237   : > { %3553 = vst [vmem:[#allocation18 + $0x50] sm:$0xff] %v3277_v55  }
 0x238   : > { %v1506_v56 = vpop.f32.mrf.mxu2 }
 0x239   : > { %v3357_v57 = vpack.c.bf16 %v1506_v56, %v1504_v48  ;;  %v1659_v58 = vpop.f32.mrf.mxu3 }
 0x23a   : > { %v3769_v15 = vpack.i.bf16 %v1659_v58, %v4566_v52  ;;  %v1292_v59 = vpop.f32.mrf.mxu1 }
 0x23b   : > { %3568 = vst [vmem:[#allocation2 + $0x10] sm:$0xff] %v3357_v57   ;;  %v1293_v1 = vadd.f32 %v4543_v22, %v1292_v59 }
 0x23c   : > { %3770 = vxpose.xlu0.b32.cont [6/16] %v3769_v15, 128 }
 0x240   : > { %v1509_v60 = vpop.f32.mrf.mxu2 }
 0x241   : > { %v1662_v62 = vpop.f32.mrf.mxu3 }
 0x242   : > { %v3771_v32 = vpack.i.bf16 %v1662_v62, %v4569_v4  ;;  %v1294_v0 = vpop.f32.mrf.mxu1 }
 0x243   : > { %v1295_v3 = vadd.f32 %v4543_v22, %v1294_v0 }
 0x244   : > { %3772 = vxpose.xlu0.b32.cont [7/16] %v3771_v32, 128 }
 0x245   : > { %v3282_v37 = vpack.c.bf16 %v1295_v3, %v1293_v1 }
 0x247   : > { %3554 = vst [vmem:[#allocation18 + $0x58] sm:$0xff] %v3282_v37  }
 0x248   : > { %v1511_v5 = vpop.f32.mrf.mxu2 }
 0x249   : > { %v3362_v6 = vpack.c.bf16 %v1511_v5, %v1509_v60  ;;  %v1664_v8 = vpop.f32.mrf.mxu3 }
 0x24a   : > { %v3773_v52 = vpack.i.bf16 %v1664_v8, %v4574_v24  ;;  %v1297_v9 = vpop.f32.mrf.mxu1 }
 0x24b   : > { %3569 = vst [vmem:[#allocation2 + $0x38] sm:$0xff] %v3362_v6   ;;  %v1298_v13 = vadd.f32 %v4543_v22, %v1297_v9 }
 0x24c   : > { %3774 = vxpose.xlu0.b32.cont [8/16] %v3773_v52, 128 }
 0x250   : > { %v1514_v10 = vpop.f32.mrf.mxu2 }
 0x251   : > { %v1667_v11 = vpop.f32.mrf.mxu3 }
 0x252   : > { %v3775_v4 = vpack.i.bf16 %v1667_v11, %v4577_v42  ;;  %v1299_v12 = vpop.f32.mrf.mxu1 }
 0x253   : > { %v1300_v17 = vadd.f32 %v4543_v22, %v1299_v12 }
 0x254   : > { %3776 = vxpose.xlu0.b32.cont [9/16] %v3775_v4, 128 }
 0x255   : > { %v3287_v18 = vpack.c.bf16 %v1300_v17, %v1298_v13 }
 0x257   : > { %3555 = vst [vmem:[#allocation18 + $0x60] sm:$0xff] %v3287_v18  }
 0x258   : > { %v1516_v19 = vpop.f32.mrf.mxu2 }
 0x259   : > { %v3367_v20 = vpack.c.bf16 %v1516_v19, %v1514_v10  ;;  %v1669_v21 = vpop.f32.mrf.mxu3 }
 0x25a   : > { %v3777_v24 = vpack.i.bf16 %v1669_v21, %v4582_v63  ;;  %v1302_v23 = vpop.f32.mrf.mxu1 }
 0x25b   : > { %3570 = vst [vmem:[#allocation2 + $0x60] sm:$0xff] %v3367_v20   ;;  %v1303_v29 = vadd.f32 %v4543_v22, %v1302_v23 }
 0x25c   : > { %3778 = vxpose.xlu0.b32.cont [10/16] %v3777_v24, 128 }
 0x260   : > { %v1519_v25 = vpop.f32.mrf.mxu2 }
 0x261   : > { %v1672_v26 = vpop.f32.mrf.mxu3 }
 0x262   : > { %v3779_v42 = vpack.i.bf16 %v1672_v26, %v4587_v16  ;;  %v1304_v28 = vpop.f32.mrf.mxu1 }
 0x263   : > { %v1305_v30 = vadd.f32 %v4543_v22, %v1304_v28 }
 0x264   : > { %3780 = vxpose.xlu0.b32.cont [11/16] %v3779_v42, 128 }
 0x265   : > { %v3292_v31 = vpack.c.bf16 %v1305_v30, %v1303_v29 }
 0x267   : > { %3556 = vst [vmem:[#allocation18 + $0x68] sm:$0xff] %v3292_v31  }
 0x268   : > { %v1521_v33 = vpop.f32.mrf.mxu2 }
 0x269   : > { %v3372_v34 = vpack.c.bf16 %v1521_v33, %v1519_v25  ;;  %v1674_v35 = vpop.f32.mrf.mxu3 }
 0x26a   : > { %v3781_v63 = vpack.i.bf16 %v1674_v35, %v4591_v39  ;;  %v1307_v36 = vpop.f32.mrf.mxu1 }
 0x26b   : > { %3571 = vst [vmem:[#allocation2 + $0x70] sm:$0xff] %v3372_v34   ;;  %v1308_v41 = vadd.f32 %v4543_v22, %v1307_v36 }
 0x26c   : > { %3782 = vxpose.xlu0.b32.cont [12/16] %v3781_v63, 128 }
 0x270   : > { %v1524_v27 = vpop.f32.mrf.mxu2 }
 0x271   : > { %v1677_v38 = vpop.f32.mrf.mxu3 }
 0x272   : > { %v3783_v16 = vpack.i.bf16 %v1677_v38, %v4593_v53  ;;  %v1309_v40 = vpop.f32.mrf.mxu1 }
 0x273   : > { %v1310_v43 = vadd.f32 %v4543_v22, %v1309_v40 }
 0x274   : > { %3784 = vxpose.xlu0.b32.cont [13/16] %v3783_v16, 128 }
 0x275   : > { %v3297_v44 = vpack.c.bf16 %v1310_v43, %v1308_v41 }
 0x277   : > { %3557 = vst [vmem:[#allocation18 + $0x70] sm:$0xff] %v3297_v44  }
 0x278   : > { %v1526_v45 = vpop.f32.mrf.mxu2 }
 0x279   : > { %v3377_v46 = vpack.c.bf16 %v1526_v45, %v1524_v27  ;;  %v1679_v47 = vpop.f32.mrf.mxu3 }
 0x27a   : > { %v3785_v39 = vpack.i.bf16 %v1679_v47, %v4597_v2  ;;  %v1312_v48 = vpop.f32.mrf.mxu1 }
 0x27b   : > { %3572 = vst [vmem:[#allocation2 + $0x78] sm:$0xff] %v3377_v46   ;;  %v1313_v51 = vadd.f32 %v4543_v22, %v1312_v48 }
 0x27c   : > { %3786 = vxpose.xlu0.b32.cont [14/16] %v3785_v39, 128 }
 0x280   : > { %v1529_v49 = vpop.f32.mrf.mxu2 }
 0x281   : > { %v1682_v61 = vpop.f32.mrf.mxu3 }
 0x282   : > { %v3787_v53 = vpack.i.bf16 %v1682_v61, %v4599_v7  ;;  %v1314_v50 = vpop.f32.mrf.mxu1 }
 0x283   : > { %v1315_v54 = vadd.f32 %v4543_v22, %v1314_v50 }
 0x284   : > { %3788 = vxpose.xlu0.b32.cont [15/16] %v3787_v53, 128 }
 0x285   : > { %v3302_v55 = vpack.c.bf16 %v1315_v54, %v1313_v51 }
 0x287   : > { %3558 = vst [vmem:[#allocation18 + $0x78] sm:$0xff] %v3302_v55  }
 0x288   : > { %v1531_v56 = vpop.f32.mrf.mxu2 }
 0x289   : > { %v3382_v57 = vpack.c.bf16 %v1531_v56, %v1529_v49  ;;  %v1684_v58 = vpop.f32.mrf.mxu3 }
 0x28a   : > { %v3789_v2 = vpack.i.bf16 %v1684_v58, %v4603_v14 }
 0x28b   : > { %3573 = vst [vmem:[#allocation2 + $0x28] sm:$0xff] %v3382_v57  }
 0x28c   : > { %3790 = vxpose.xlu0.b32.end [16/16] %v3789_v2, 128 }
 0x2b8   : > { %v3791_v15 = vpop.trf.xlu0 }
 0x2b9   : > { %v3795_v59 = vunpack.i.h.bf16 %v3791_v15  ;;  %v3792_v60 = vunpack.i.l.bf16 %v3791_v15 }
 0x2c0   : > { %v3796_v62 = vpop.trf.xlu0 }
 0x2c1   : > { %v3800_v7 = vunpack.i.h.bf16 %v3796_v62  ;;  %v3797_v32 = vunpack.i.l.bf16 %v3796_v62 }
 0x2c3   : > { %v3387_v0 = vpack.c.bf16 %v3797_v32, %v3792_v60  ;;  %v3427_v1 = vpack.c.bf16 %v3800_v7, %v3795_v59 }
 0x2c5   : > { %3388 = vst [vmem:[#allocation3 + $0x28] sm:$0xff] %v3387_v0  }
 0x2c6   : > { %3428 = vst [vmem:[#allocation3 + $0x20] sm:$0xff] %v3427_v1  }
 0x2c8   : > { %v3801_v22 = vpop.trf.xlu0 }
 0x2c9   : > { %v3805_v3 = vunpack.i.h.bf16 %v3801_v22  ;;  %v3802_v37 = vunpack.i.l.bf16 %v3801_v22 }
 0x2d0   : > { %v3806_v5 = vpop.trf.xlu0 }
 0x2d1   : > { %v3810_v6 = vunpack.i.h.bf16 %v3806_v5  ;;  %v3807_v8 = vunpack.i.l.bf16 %v3806_v5 }
 0x2d3   : > { %v3392_v52 = vpack.c.bf16 %v3807_v8, %v3802_v37  ;;  %v3432_v14 = vpack.c.bf16 %v3810_v6, %v3805_v3 }
 0x2d5   : > { %3574 = vst [vmem:[#allocation3 + $0x68] sm:$0xff] %v3392_v52  }
 0x2d6   : > { %3581 = vst [vmem:[#allocation3 + $0x78] sm:$0xff] %v3432_v14  }
 0x2d8   : > { %v3811_v9 = vpop.trf.xlu0 }
 0x2d9   : > { %v3815_v10 = vunpack.i.h.bf16 %v3811_v9  ;;  %v3812_v11 = vunpack.i.l.bf16 %v3811_v9 }
 0x2e0   : > { %v3816_v4 = vpop.trf.xlu0 }
 0x2e1   : > { %v3820_v12 = vunpack.i.h.bf16 %v3816_v4  ;;  %v3817_v13 = vunpack.i.l.bf16 %v3816_v4 }
 0x2e3   : > { %v3397_v17 = vpack.c.bf16 %v3817_v13, %v3812_v11  ;;  %v3437_v18 = vpack.c.bf16 %v3820_v12, %v3815_v10 }
 0x2e5   : > { %3575 = vst [vmem:[#allocation3 + $0x10] sm:$0xff] %v3397_v17  }
 0x2e6   : > { %3582 = vst [vmem:[#allocation3 + $0x18] sm:$0xff] %v3437_v18  }
 0x2e8   : > { %v3821_v19 = vpop.trf.xlu0 }
 0x2e9   : > { %v3825_v20 = vunpack.i.h.bf16 %v3821_v19  ;;  %v3822_v21 = vunpack.i.l.bf16 %v3821_v19 }
 0x2f0   : > { %v3826_v24 = vpop.trf.xlu0 }
 0x2f1   : > { %v3830_v23 = vunpack.i.h.bf16 %v3826_v24  ;;  %v3827_v25 = vunpack.i.l.bf16 %v3826_v24 }
 0x2f3   : > { %v3402_v26 = vpack.c.bf16 %v3827_v25, %v3822_v21  ;;  %v3442_v42 = vpack.c.bf16 %v3830_v23, %v3825_v20 }
 0x2f5   : > { %3576 = vst [vmem:[#allocation3 + $0x40] sm:$0xff] %v3402_v26  }
 0x2f6   : > { %3583 = vst [vmem:[#allocation3 + $0x58] sm:$0xff] %v3442_v42  }
 0x2f8   : > { %v3831_v28 = vpop.trf.xlu0 }
 0x2f9   : > { %v3835_v29 = vunpack.i.h.bf16 %v3831_v28  ;;  %v3832_v30 = vunpack.i.l.bf16 %v3831_v28 }
 0x300   : > { %v3836_v31 = vpop.trf.xlu0 }
 0x301   : > { %v3840_v33 = vunpack.i.h.bf16 %v3836_v31  ;;  %v3837_v34 = vunpack.i.l.bf16 %v3836_v31 }
 0x303   : > { %v3407_v35 = vpack.c.bf16 %v3837_v34, %v3832_v30  ;;  %v3447_v63 = vpack.c.bf16 %v3840_v33, %v3835_v29 }
 0x305   : > { %3577 = vst [vmem:[#allocation3 + $0x48] sm:$0xff] %v3407_v35  }
 0x306   : > { %3584 = vst [vmem:[#allocation3] sm:$0xff] %v3447_v63  }
 0x308   : > { %v3841_v36 = vpop.trf.xlu0 }
 0x309   : > { %v3845_v27 = vunpack.i.h.bf16 %v3841_v36  ;;  %v3842_v38 = vunpack.i.l.bf16 %v3841_v36 }
 0x310   : > { %v3846_v16 = vpop.trf.xlu0 }
 0x311   : > { %v3850_v40 = vunpack.i.h.bf16 %v3846_v16  ;;  %v3847_v41 = vunpack.i.l.bf16 %v3846_v16 }
 0x313   : > { %v3412_v43 = vpack.c.bf16 %v3847_v41, %v3842_v38  ;;  %v3452_v44 = vpack.c.bf16 %v3850_v40, %v3845_v27 }
 0x315   : > { %3578 = vst [vmem:[#allocation3 + $0x30] sm:$0xff] %v3412_v43  }
 0x316   : > { %3585 = vst [vmem:[#allocation3 + $0x8] sm:$0xff] %v3452_v44  }
 0x318   : > { %v3851_v45 = vpop.trf.xlu0 }
 0x319   : > { %v3855_v46 = vunpack.i.h.bf16 %v3851_v45  ;;  %v3852_v47 = vunpack.i.l.bf16 %v3851_v45 }
 0x320   : > { %v3856_v39 = vpop.trf.xlu0 }
 0x321   : > { %v3860_v48 = vunpack.i.h.bf16 %v3856_v39  ;;  %v3857_v49 = vunpack.i.l.bf16 %v3856_v39 }
 0x323   : > { %v3417_v61 = vpack.c.bf16 %v3857_v49, %v3852_v47  ;;  %v3457_v53 = vpack.c.bf16 %v3860_v48, %v3855_v46 }
 0x325   : > { %3579 = vst [vmem:[#allocation3 + $0x70] sm:$0xff] %v3417_v61  }
 0x326   : > { %3586 = vst [vmem:[#allocation3 + $0x60] sm:$0xff] %v3457_v53  }
 0x328   : > { %v3861_v50 = vpop.trf.xlu0 }
 0x329   : > { %v3865_v51 = vunpack.i.h.bf16 %v3861_v50  ;;  %v3862_v54 = vunpack.i.l.bf16 %v3861_v50 }
 0x330   : > { %v3866_v55 = vpop.trf.xlu0 }
 0x331   : > { %v3870_v56 = vunpack.i.h.bf16 %v3866_v55  ;;  %v3867_v57 = vunpack.i.l.bf16 %v3866_v55 }
 0x333   : > { %v3422_v58 = vpack.c.bf16 %v3867_v57, %v3862_v54  ;;  %v3462_v2 = vpack.c.bf16 %v3870_v56, %v3865_v51 }
 0x335   : > { %3580 = vst [vmem:[#allocation3 + $0x38] sm:$0xff] %v3422_v58  }
 0x336   : > { %3587 = vst [vmem:[#allocation3 + $0x50] sm:$0xff] %v3462_v2  }
 0x337 PF: > { %v3190_v15 = vld [vmem:[%s4501_s24 + $0x38] sm:$0xff]  ;;  %v3189_v59 = vld [vmem:[%s4501_s24 + $0x30] sm:$0xff]  ;;  %v3188_v60 = vld [vmem:[%s4501_s24 + $0x28] sm:$0xff]  ;;  %s1896_s28 = sld [smem:[#allocation16 + %s4259_s20]]  ;;  %s4277_s16 = smov [#allocation17]  }
 0x338   : > { %2009 = vmatpush.bf16.msra.mxu0 %v3190_v15  ;;  %2277 = vmatpush.bf16.msra.mxu2 %v3190_v15  ;;  %v3187_v62 = vld [vmem:[%s4501_s24 + $0x20] sm:$0xff]  ;;  %v3186_v7 = vld [vmem:[%s4501_s24 + $0x18] sm:$0xff]  ;;  %v3185_v32 = vld [vmem:[%s4501_s24 + $0x10] sm:$0xff]  ;;  %s2495_s0 = sshll.u32 %s4277_s16, 4  ;;  %s2481_s25 = sand.u32 1, %s4381_s23   ;;  %s2496_s0 = int_to_ptr.vmem [resolvable:$true] %s2495_s0 }
 0x339   : > { %v3184_v0 = vld [vmem:[%s4501_s24 + $0x8] sm:$0xff]  ;;  %v3183_v1 = vld [vmem:[%s4501_s24] sm:$0xff]  ;;  %v3191_v22 = vld [vmem:[#allocation2 + $0x30] sm:$0xff]  ;;  %s2497_s24 = sshll.u32 %s4768_s9, 4  ;;  %s4278_s14 = smov 128   ;;  %s2498_s24 = int_to_ptr.hbm [resolvable:$true] %s2497_s24 }
 0x33a   : > { %v3207_v3 = vld [vmem:[#allocation2 + $0x40] sm:$0xff]  ;;  %v3193_v6 = vld [vmem:[#allocation2 + $0x58] sm:$0xff]  ;;  %v3209_v8 = vld [vmem:[#allocation2 + $0x10] sm:$0xff]  ;;  %s4279_s5 = smov 8   ;;  %s4280_s11 = smov [#allocation18]  }
 0x33b   : > { %v3192_v37 = vld [vmem:[#allocation2] sm:$0xff]  ;;  %v3194_v52 = vld [vmem:[#allocation2 + $0x18] sm:$0xff]  ;;  %v3195_v9 = vld [vmem:[#allocation2 + $0x50] sm:$0xff]  ;;  %3630 = dma.vmem_to_hbm [thread:$0]  (%p314_p10), %s2496_s0, 4096, %s2498_s24, [#allocation6], %s4278_s14, %s4278_s14, %s4279_s5  }
 0x33c   : > { %2010 = vmatpush.bf16.msra.mxu0 %v3189_v59  ;;  %2278 = vmatpush.bf16.msra.mxu2 %v3189_v59  ;;  %v3208_v5 = vld [vmem:[#allocation2 + $0x20] sm:$0xff]  ;;  %v3210_v14 = vld [vmem:[#allocation2 + $0x38] sm:$0xff]  ;;  %v3205_v12 = vld [vmem:[#allocation3 + $0x70] sm:$0xff]  ;;  %s2513_s12 = sshll.u32 %s4280_s11, 4  ;;  %s4281_s16 = smov 64   ;;  %s2514_s12 = int_to_ptr.vmem [resolvable:$true] %s2513_s12 }
 0x33d   : > { %v3211_v10 = vld [vmem:[#allocation2 + $0x60] sm:$0xff]  ;;  %v3206_v11 = vld [vmem:[#allocation3 + $0x38] sm:$0xff]  ;;  %v3222_v4 = vld [vmem:[#allocation3 + $0x50] sm:$0xff]  ;;  %s4282_s3 = smov 4   ;;  %s2482_s0 = scalar_lea.sflag [#allocation6], %s2481_s25 }
 0x33e   : > { %2131 = vmatpush.bf16.msra.mxu1 %v3206_v11  ;;  %2399 = vmatpush.bf16.msra.mxu3 %v3222_v4  ;;  %v3196_v13 = vld [vmem:[#allocation2 + $0x68] sm:$0xff]  ;;  %v3212_v17 = vld [vmem:[#allocation2 + $0x70] sm:$0xff]  ;;  %v3221_v19 = vld [vmem:[#allocation3 + $0x60] sm:$0xff] }
 0x33f   : > { %v3204_v18 = vld [vmem:[#allocation3 + $0x30] sm:$0xff]  ;;  %v3203_v20 = vld [vmem:[#allocation3 + $0x48] sm:$0xff]  ;;  %v3202_v24 = vld [vmem:[#allocation3 + $0x40] sm:$0xff] }
 0x340   : > { %2011 = vmatpush.bf16.msra.mxu0 %v3188_v60  ;;  %2279 = vmatpush.bf16.msra.mxu2 %v3188_v60  ;;  %v3220_v21 = vld [vmem:[#allocation3 + $0x8] sm:$0xff]  ;;  %v3219_v23 = vld [vmem:[#allocation3] sm:$0xff]  ;;  %v3201_v25 = vld [vmem:[#allocation3 + $0x10] sm:$0xff] }
 0x341   : > { %v3197_v26 = vld [vmem:[#allocation2 + $0x8] sm:$0xff]  ;;  %v3213_v42 = vld [vmem:[#allocation2 + $0x78] sm:$0xff]  ;;  %v3215_v34 = vld [vmem:[#allocation3 + $0x20] sm:$0xff] }
 0x342   : > { %2132 = vmatpush.bf16.msra.mxu1 %v3205_v12  ;;  %2400 = vmatpush.bf16.msra.mxu3 %v3221_v19  ;;  %v3218_v28 = vld [vmem:[#allocation3 + $0x58] sm:$0xff]  ;;  %v3200_v29 = vld [vmem:[#allocation3 + $0x68] sm:$0xff] }
 0x343   : > { %v3217_v30 = vld [vmem:[#allocation3 + $0x18] sm:$0xff]  ;;  %v3199_v31 = vld [vmem:[#allocation3 + $0x28] sm:$0xff] }
 0x344   : > { %2012 = vmatpush.bf16.msra.mxu0 %v3187_v62  ;;  %2280 = vmatpush.bf16.msra.mxu2 %v3187_v62  ;;  %v3216_v33 = vld [vmem:[#allocation3 + $0x78] sm:$0xff]  ;;  %v3198_v35 = vld [vmem:[#allocation2 + $0x48] sm:$0xff] }
 0x345   : > { %v3214_v63 = vld [vmem:[#allocation2 + $0x28] sm:$0xff] }
 0x346   : > { %2133 = vmatpush.bf16.msra.mxu1 %v3204_v18  ;;  %2401 = vmatpush.bf16.msra.mxu3 %v3220_v21 }
 0x348   : > { %2013 = vmatpush.bf16.msra.mxu0 %v3186_v7  ;;  %2281 = vmatpush.bf16.msra.mxu2 %v3186_v7 }
 0x34a   : > { %2134 = vmatpush.bf16.msra.mxu1 %v3203_v20  ;;  %2402 = vmatpush.bf16.msra.mxu3 %v3219_v23  ;;  %v4646_v20 = vstv %s1896_s28  ;;  %s2515_s28 = sshll.u32 %s4769_s10, 4  ;;  %s2516_s28 = int_to_ptr.hbm [resolvable:$true] %s2515_s28 }
 0x34b   : > { %3632 = dma.vmem_to_hbm [thread:$0]  (%p314_p10), %s2514_s12, 2048, %s2516_s28, [#allocation19], %s4281_s16, %s4281_s16, %s4282_s3  }
 0x34c   : > { %2014 = vmatpush.bf16.msra.mxu0 %v3185_v32  ;;  %2282 = vmatpush.bf16.msra.mxu2 %v3185_v32 }
 0x34e   : > { %2135 = vmatpush.bf16.msra.mxu1 %v3202_v24  ;;  %2403 = vmatpush.bf16.msra.mxu3 %v3218_v28 }
 0x350   : > { %2015 = vmatpush.bf16.msra.mxu0 %v3184_v0  ;;  %2283 = vmatpush.bf16.msra.mxu2 %v3184_v0 }
 0x352   : > { %2136 = vmatpush.bf16.msra.mxu1 %v3201_v25  ;;  %2404 = vmatpush.bf16.msra.mxu3 %v3217_v30 }
 0x354   : > { %2016 = vmatpush.bf16.msra.mxu0 %v3183_v1  ;;  %2284 = vmatpush.bf16.msra.mxu2 %v3183_v1 }
 0x356   : > { %2137 = vmatpush.bf16.msra.mxu1 %v3200_v29  ;;  %2405 = vmatpush.bf16.msra.mxu3 %v3216_v33 }
 0x357   : > { %2017 = vmatmul.bf16.vlgmr.msra.gmra.mxu0 %v3191_v22  ;;  %2285 = vmatmul.bf16.vlgmr.msra.gmra.mxu2 %v3207_v3 }
 0x35a   : > { %2138 = vmatpush.bf16.msra.mxu1 %v3199_v31  ;;  %2406 = vmatpush.bf16.msra.mxu3 %v3215_v34 }
 0x367   : > { %2022 = vmatmul.bf16.gmra.mxu0 %v3192_v37  ;;  %2290 = vmatmul.bf16.gmra.mxu2 %v3208_v5 }
 0x377   : > { %2027 = vmatmul.bf16.gmra.mxu0 %v3193_v6  ;;  %2295 = vmatmul.bf16.gmra.mxu2 %v3209_v8 }
 0x387   : > { %2032 = vmatmul.bf16.gmra.mxu0 %v3194_v52  ;;  %2300 = vmatmul.bf16.gmra.mxu2 %v3210_v14 }
 0x397   : > { %2037 = vmatmul.bf16.gmra.mxu0 %v3195_v9  ;;  %2305 = vmatmul.bf16.gmra.mxu2 %v3211_v10 }
 0x3a7   : > { %2042 = vmatmul.bf16.gmra.mxu0 %v3196_v13  ;;  %2310 = vmatmul.bf16.gmra.mxu2 %v3212_v17 }
 0x3b7   : > { %2047 = vmatmul.bf16.gmra.mxu0 %v3197_v26  ;;  %2315 = vmatmul.bf16.gmra.mxu2 %v3213_v42 }
 0x3c7   : > { %2052 = vmatmul.bf16.gmra.mxu0 %v3198_v35  ;;  %2320 = vmatmul.bf16.gmra.mxu2 %v3214_v63 }
 0x3d4   : > { %v2018_v36 = vpop.f32.mrf.mxu0 }
 0x3da   : > { %v2286_v27 = vpop.f32.mrf.mxu2 }
 0x3dc   : > { %v2020_v38 = vpop.f32.mrf.mxu0 }
 0x3dd   : > { %v2058_v16 = vpack.c.bf16 %v2020_v38, %v2018_v36 }
 0x3df   : > { %2139 = vmatmul.bf16.vlgmr.msra.gmra.mxu1 %v2058_v16 }
 0x3e2   : > { %v2288_v40 = vpop.f32.mrf.mxu2 }
 0x3e3   : > { %v2326_v41 = vpack.c.bf16 %v2288_v40, %v2286_v27 }
 0x3e4   : > { %v2023_v43 = vpop.f32.mrf.mxu0 }
 0x3e5   : > { %2407 = vmatmul.bf16.vlgmr.msra.gmra.mxu3 %v2326_v41 }
 0x3ea   : > { %v2291_v44 = vpop.f32.mrf.mxu2 }
 0x3ec   : > { %v2025_v45 = vpop.f32.mrf.mxu0 }
 0x3ed   : > { %v2059_v46 = vpack.c.bf16 %v2025_v45, %v2023_v43 }
 0x3ef   : > { %2144 = vmatmul.bf16.gmra.mxu1 %v2059_v46 }
 0x3f2   : > { %v2293_v47 = vpop.f32.mrf.mxu2 }
 0x3f3   : > { %v2327_v39 = vpack.c.bf16 %v2293_v47, %v2291_v44 }
 0x3f4   : > { %v2028_v48 = vpop.f32.mrf.mxu0 }
 0x3f5   : > { %2412 = vmatmul.bf16.gmra.mxu3 %v2327_v39 }
 0x3fa   : > { %v2296_v49 = vpop.f32.mrf.mxu2 }
 0x3fc   : > { %v2030_v61 = vpop.f32.mrf.mxu0 }
 0x3fd   : > { %v2060_v53 = vpack.c.bf16 %v2030_v61, %v2028_v48 }
 0x3ff   : > { %2149 = vmatmul.bf16.gmra.mxu1 %v2060_v53 }
 0x402   : > { %v2298_v50 = vpop.f32.mrf.mxu2 }
 0x403   : > { %v2328_v51 = vpack.c.bf16 %v2298_v50, %v2296_v49 }
 0x404   : > { %v2033_v54 = vpop.f32.mrf.mxu0 }
 0x405   : > { %2417 = vmatmul.bf16.gmra.mxu3 %v2328_v51 }
 0x40a   : > { %v2301_v55 = vpop.f32.mrf.mxu2 }
 0x40c   : > { %v2035_v56 = vpop.f32.mrf.mxu0 }
 0x40d   : > { %v2061_v57 = vpack.c.bf16 %v2035_v56, %v2033_v54 }
 0x40f   : > { %2154 = vmatmul.bf16.gmra.mxu1 %v2061_v57 }
 0x412   : > { %v2303_v58 = vpop.f32.mrf.mxu2 }
 0x413   : > { %v2329_v2 = vpack.c.bf16 %v2303_v58, %v2301_v55 }
 0x414   : > { %v2038_v15 = vpop.f32.mrf.mxu0 }
 0x415   : > { %2422 = vmatmul.bf16.gmra.mxu3 %v2329_v2 }
 0x41a   : > { %v2306_v59 = vpop.f32.mrf.mxu2 }
 0x41c   : > { %v2040_v60 = vpop.f32.mrf.mxu0 }
 0x41d   : > { %v2062_v62 = vpack.c.bf16 %v2040_v60, %v2038_v15 }
 0x41f   : > { %2159 = vmatmul.bf16.gmra.mxu1 %v2062_v62 }
 0x422   : > { %v2308_v7 = vpop.f32.mrf.mxu2 }
 0x423   : > { %v2330_v32 = vpack.c.bf16 %v2308_v7, %v2306_v59 }
 0x424   : > { %v2043_v0 = vpop.f32.mrf.mxu0 }
 0x425   : > { %2427 = vmatmul.bf16.gmra.mxu3 %v2330_v32 }
 0x42a   : > { %v2311_v1 = vpop.f32.mrf.mxu2 }
 0x42c   : > { %v2045_v22 = vpop.f32.mrf.mxu0 }
 0x42d   : > { %v2063_v3 = vpack.c.bf16 %v2045_v22, %v2043_v0 }
 0x42f   : > { %2164 = vmatmul.bf16.gmra.mxu1 %v2063_v3 }
 0x432   : > { %v2313_v37 = vpop.f32.mrf.mxu2 }
 0x433   : > { %v2331_v5 = vpack.c.bf16 %v2313_v37, %v2311_v1 }
 0x434   : > { %v2048_v6 = vpop.f32.mrf.mxu0 }
 0x435   : > { %2432 = vmatmul.bf16.gmra.mxu3 %v2331_v5 }
 0x43a   : > { %v2316_v8 = vpop.f32.mrf.mxu2 }
 0x43c   : > { %v2050_v52 = vpop.f32.mrf.mxu0 }
 0x43d   : > { %v2064_v14 = vpack.c.bf16 %v2050_v52, %v2048_v6 }
 0x43f   : > { %2169 = vmatmul.bf16.gmra.mxu1 %v2064_v14 }
 0x442   : > { %v2318_v9 = vpop.f32.mrf.mxu2 }
 0x443   : > { %v2332_v10 = vpack.c.bf16 %v2318_v9, %v2316_v8 }
 0x444   : > { %v2053_v11 = vpop.f32.mrf.mxu0 }
 0x445   : > { %2437 = vmatmul.bf16.gmra.mxu3 %v2332_v10 }
 0x44a   : > { %v2321_v4 = vpop.f32.mrf.mxu2 }
 0x44c   : > { %v2055_v12 = vpop.f32.mrf.mxu0 }
 0x44d   : > { %v2065_v13 = vpack.c.bf16 %v2055_v12, %v2053_v11 }
 0x44f   : > { %2174 = vmatmul.bf16.gmra.mxu1 %v2065_v13 }
 0x452   : > { %v2323_v17 = vpop.f32.mrf.mxu2 }
 0x453   : > { %v2333_v18 = vpack.c.bf16 %v2323_v17, %v2321_v4 }
 0x455   : > { %2442 = vmatmul.bf16.gmra.mxu3 %v2333_v18 }
 0x45c   : > { %v2140_v19 = vpop.f32.mrf.mxu1 }
 0x45d   : > { %v2141_v24 = vadd.f32 %v2140_v19, %v4646_v20 }
 0x464   : > { %v2142_v21 = vpop.f32.mrf.mxu1 }
 0x465   : > { %v2143_v23 = vadd.f32 %v2142_v21, %v4646_v20 }
 0x467   : > { %v3467_v25 = vpack.c.bf16 %v2143_v23, %v2141_v24 }
 0x468   : > { %v2408_v26 = vpop.f32.mrf.mxu3 }
 0x469   : > { %3468 = vst [vmem:[%s4511_s13] sm:$0xff] %v3467_v25   ;;  %v2409_v29 = vadd.f32 %v2408_v26, %v4646_v20 }
 0x46c   : > { %v2145_v42 = vpop.f32.mrf.mxu1 }
 0x46d   : > { %v2146_v34 = vadd.f32 %v2145_v42, %v4646_v20 }
 0x470   : > { %v2410_v28 = vpop.f32.mrf.mxu3 }
 0x471   : > { %v2411_v30 = vadd.f32 %v2410_v28, %v4646_v20 }
 0x473   : > { %v3507_v31 = vpack.c.bf16 %v2411_v30, %v2409_v29 }
 0x474   : > { %v2147_v33 = vpop.f32.mrf.mxu1 }
 0x475   : > { %3595 = vst [vmem:[%s4511_s13 + $0x40] sm:$0xff] %v3507_v31   ;;  %v2148_v35 = vadd.f32 %v2147_v33, %v4646_v20 }
 0x477   : > { %v3472_v63 = vpack.c.bf16 %v2148_v35, %v2146_v34 }
 0x478   : > { %v2413_v36 = vpop.f32.mrf.mxu3 }
 0x479   : > { %3588 = vst [vmem:[%s4511_s13 + $0x8] sm:$0xff] %v3472_v63   ;;  %v2414_v16 = vadd.f32 %v2413_v36, %v4646_v20 }
 0x47c   : > { %v2150_v27 = vpop.f32.mrf.mxu1 }
 0x47d   : > { %v2151_v44 = vadd.f32 %v2150_v27, %v4646_v20 }
 0x480   : > { %v2415_v38 = vpop.f32.mrf.mxu3 }
 0x481   : > { %v2416_v40 = vadd.f32 %v2415_v38, %v4646_v20 }
 0x483   : > { %v3512_v41 = vpack.c.bf16 %v2416_v40, %v2414_v16 }
 0x484   : > { %v2152_v43 = vpop.f32.mrf.mxu1 }
 0x485   : > { %3596 = vst [vmem:[%s4511_s13 + $0x48] sm:$0xff] %v3512_v41   ;;  %v2153_v45 = vadd.f32 %v2152_v43, %v4646_v20 }
 0x487   : > { %v3477_v46 = vpack.c.bf16 %v2153_v45, %v2151_v44 }
 0x488   : > { %v2418_v47 = vpop.f32.mrf.mxu3 }
 0x489   : > { %3589 = vst [vmem:[%s4511_s13 + $0x10] sm:$0xff] %v3477_v46   ;;  %v2419_v49 = vadd.f32 %v2418_v47, %v4646_v20 }
 0x48c   : > { %v2155_v39 = vpop.f32.mrf.mxu1 }
 0x48d   : > { %v2156_v51 = vadd.f32 %v2155_v39, %v4646_v20 }
 0x490   : > { %v2420_v48 = vpop.f32.mrf.mxu3 }
 0x491   : > { %v2421_v61 = vadd.f32 %v2420_v48, %v4646_v20 }
 0x493   : > { %v3517_v53 = vpack.c.bf16 %v2421_v61, %v2419_v49 }
 0x494   : > { %v2157_v50 = vpop.f32.mrf.mxu1 }
 0x495   : > { %3597 = vst [vmem:[%s4511_s13 + $0x50] sm:$0xff] %v3517_v53   ;;  %v2158_v54 = vadd.f32 %v2157_v50, %v4646_v20 }
 0x497   : > { %v3482_v55 = vpack.c.bf16 %v2158_v54, %v2156_v51 }
 0x498   : > { %v2423_v56 = vpop.f32.mrf.mxu3 }
 0x499   : > { %3590 = vst [vmem:[%s4511_s13 + $0x18] sm:$0xff] %v3482_v55   ;;  %v2424_v2 = vadd.f32 %v2423_v56, %v4646_v20 }
 0x49c   : > { %v2160_v57 = vpop.f32.mrf.mxu1 }
 0x49d   : > { %v2161_v62 = vadd.f32 %v2160_v57, %v4646_v20 }
 0x4a0   : > { %v2425_v58 = vpop.f32.mrf.mxu3 }
 0x4a1   : > { %v2426_v15 = vadd.f32 %v2425_v58, %v4646_v20 }
 0x4a3   : > { %v3522_v59 = vpack.c.bf16 %v2426_v15, %v2424_v2 }
 0x4a4   : > { %v2162_v60 = vpop.f32.mrf.mxu1 }
 0x4a5   : > { %3598 = vst [vmem:[%s4511_s13 + $0x58] sm:$0xff] %v3522_v59   ;;  %v2163_v7 = vadd.f32 %v2162_v60, %v4646_v20 }
 0x4a7   : > { %v3487_v32 = vpack.c.bf16 %v2163_v7, %v2161_v62 }
 0x4a8   : > { %v2428_v0 = vpop.f32.mrf.mxu3 }
 0x4a9   : > { %3591 = vst [vmem:[%s4511_s13 + $0x20] sm:$0xff] %v3487_v32   ;;  %v2429_v3 = vadd.f32 %v2428_v0, %v4646_v20 }
 0x4ac   : > { %v2165_v1 = vpop.f32.mrf.mxu1 }
 0x4ad   : > { %v2166_v8 = vadd.f32 %v2165_v1, %v4646_v20 }
 0x4b0   : > { %v2430_v22 = vpop.f32.mrf.mxu3 }
 0x4b1   : > { %v2431_v37 = vadd.f32 %v2430_v22, %v4646_v20 }
 0x4b3   : > { %v3527_v5 = vpack.c.bf16 %v2431_v37, %v2429_v3 }
 0x4b4   : > { %v2167_v6 = vpop.f32.mrf.mxu1 }
 0x4b5   : > { %3599 = vst [vmem:[%s4511_s13 + $0x60] sm:$0xff] %v3527_v5   ;;  %v2168_v52 = vadd.f32 %v2167_v6, %v4646_v20 }
 0x4b7   : > { %v3492_v14 = vpack.c.bf16 %v2168_v52, %v2166_v8 }
 0x4b8   : > { %v2433_v9 = vpop.f32.mrf.mxu3 }
 0x4b9   : > { %3592 = vst [vmem:[%s4511_s13 + $0x28] sm:$0xff] %v3492_v14   ;;  %v2434_v4 = vadd.f32 %v2433_v9, %v4646_v20 }
 0x4bc   : > { %v2170_v10 = vpop.f32.mrf.mxu1 }
 0x4bd   : > { %v2171_v18 = vadd.f32 %v2170_v10, %v4646_v20 }
 0x4c0   : > { %v2435_v11 = vpop.f32.mrf.mxu3 }
 0x4c1   : > { %v2436_v12 = vadd.f32 %v2435_v11, %v4646_v20 }
 0x4c3   : > { %v3532_v13 = vpack.c.bf16 %v2436_v12, %v2434_v4 }
 0x4c4   : > { %v2172_v17 = vpop.f32.mrf.mxu1 }
 0x4c5   : > { %3600 = vst [vmem:[%s4511_s13 + $0x68] sm:$0xff] %v3532_v13   ;;  %v2173_v19 = vadd.f32 %v2172_v17, %v4646_v20 }
 0x4c7   : > { %v3497_v21 = vpack.c.bf16 %v2173_v19, %v2171_v18 }
 0x4c8   : > { %v2438_v24 = vpop.f32.mrf.mxu3 }
 0x4c9   : > { %3593 = vst [vmem:[%s4511_s13 + $0x30] sm:$0xff] %v3497_v21   ;;  %v2439_v26 = vadd.f32 %v2438_v24, %v4646_v20 }
 0x4cc   : > { %v2175_v23 = vpop.f32.mrf.mxu1 }
 0x4cd   : > { %v2176_v30 = vadd.f32 %v2175_v23, %v4646_v20 }
 0x4d0   : > { %v2440_v25 = vpop.f32.mrf.mxu3 }
 0x4d1   : > { %v2441_v42 = vadd.f32 %v2440_v25, %v4646_v20 }
 0x4d3   : > { %v3537_v28 = vpack.c.bf16 %v2441_v42, %v2439_v26 }
 0x4d4   : > { %v2177_v29 = vpop.f32.mrf.mxu1 }
 0x4d5   : > { %3601 = vst [vmem:[%s4511_s13 + $0x70] sm:$0xff] %v3537_v28   ;;  %v2178_v31 = vadd.f32 %v2177_v29, %v4646_v20 }
 0x4d7   : > { %v3502_v33 = vpack.c.bf16 %v2178_v31, %v2176_v30 }
 0x4d8   : > { %v2443_v34 = vpop.f32.mrf.mxu3 }
 0x4d9   : > { %3594 = vst [vmem:[%s4511_s13 + $0x38] sm:$0xff] %v3502_v33   ;;  %v2444_v63 = vadd.f32 %v2443_v34, %v4646_v20 }
 0x4e0   : > { %v2445_v35 = vpop.f32.mrf.mxu3 }
 0x4e1   : > { %v2446_v36 = vadd.f32 %v2445_v35, %v4646_v20 }
 0x4e3   : > { %v3542_v27 = vpack.c.bf16 %v2446_v36, %v2444_v63 }
 0x4e5   : > { %3602 = vst [vmem:[%s4511_s13 + $0x78] sm:$0xff] %v3542_v27  }
 0x4e6   : > { %s3223_s27 = sshll.u32 %s4259_s20, 6  ;;  %s2543_s24 = sshll.u32 %s4511_s13, 4  ;;  %s2544_s24 = int_to_ptr.vmem [resolvable:$true] %s2543_s24 }
 0x4e7   : > { %s4790_s11 = sld [smem:[#allocation35_spill]]  ;;  %s4283_s26 = smov 1024  }
 0x4e8   : > { %3633 = sst [smem:[#allocation22]] (%p4464_p13), %s4283_s26  ;;  %s4284_s25 = smov 4096  }
 0x4e9   : > { %3634 = sst [smem:[#allocation22 + $0x1]] (%p4464_p13), %s4284_s25  ;;  %s4285_s28 = smov 16  }
 0x4ea   : > { %3635 = sst [smem:[#allocation22 + $0x2]] (%p4464_p13), %s4285_s28  ;;  %s4286_s20 = smov 64  }
 0x4eb   : > { %3636 = sst [smem:[#allocation22 + $0x3]] (%p4464_p13), %s4286_s20  ;;  %s4287_s13 = smov 4  }
 0x4ec   : > { %3637 = sst [smem:[#allocation22 + $0x4]] (%p4464_p13), %s4286_s20  ;;  %s4288_s16 = smov [#allocation21]  }
 0x4ed   : > { %s2532_s12 = scalar_lea.hbm %s4790_s11, %s3223_s27  ;;  %3638 = sst [smem:[#allocation22 + $0x5]] (%p4464_p13), %s4287_s13 }
 0x4ee   : > { %s2545_s15 = sshll.u32 %s2532_s12, 4  ;;  %s4289_s3 = smov 0   ;;  %s2546_s15 = int_to_ptr.hbm [resolvable:$true] %s2545_s15 }
 0x4ef   : > { %3639 = dma.general (%p4464_p13), %s2544_s24, 2048, %s2546_s15, %s2482_s0, %s4288_s16, [#allocation22], %s4289_s3, 0  }
 0x4f0   : > { %4234 = dma.done.wait (%p314_p10), [#allocation6], 4096  }
 0x4f1   : > { %4236 = vsyncadd (%p314_p10), [#allocation6], 4294963200 }
 0x4f2   : > { %4238 = dma.done.wait (%p314_p10), [#allocation19], 2048  }
 0x4f3   : > { %4240 = vsyncadd (%p314_p10), [#allocation19], 4294965248 }
 0x4f4 PF: > { %p3689_p1 = scmp.ge.s32.totalorder %s4267_s22, 2  ;;  %s4791_s27 = sadd.s32 4294967294, %s4267_s22  }
 0x4f5   : > { %s2583_s30 = sand.u32 1, %s4791_s27  }
 0x4f6   : > { %p3669_p7 = pnand %p3689_p1, %p4473_p4  ;;  %s2584_s0 = scalar_lea.sflag [#allocation6], %s2583_s30 }
 0x4f8   : > { %p3670_p8 = pneg %p3669_p7 }
 0x4fa   : > { %4242 = dma.done.wait (%p3670_p8), %s2584_s0, 2048  }
 0x4fb   : > { %4244 = vsyncadd (%p3670_p8), %s2584_s0, 4294965248  ;;  %s31_s22 = sadd.s32 1, %s4267_s22   ;;  %s4792_s17 = smov %s4251_s18 }
 0x4fc   : > { %p28_p9 = scmp.ge.s32.totalorder %s31_s22, 6   ;;  %s4793_s18 = smov %s4255_s19 }
 0x4fd   : > { %s4794_s19 = smov %s4471_s1  ;;  %s4795_s20 = smov %s4263_s21 }
 0x4fe   : > { %s4796_s21 = smov %s4798_s29  ;;  %30 = sbr.rel (!%p28_p9) target bundleno = 16 (0x10), region = 158 }
 0x503   :  { %2590 = vsyncpa [#allocation5], 1 }
 0x504   :  { %2592 = vsyncpa [#allocation5 + $0x1], 1 }
 0x505   :  { %2593 = vsyncpa [#allocation9], 1 }
 0x506   :  { %2594 = vsyncpa [#allocation12], 1 }
 0x507   :  { %2595 = vsyncpa [#allocation15], 1 }
 0x508   :  { %2597 = vsyncpa [#allocation15 + $0x1], 1 }
 0x509   :  { %2598 = vsyncpa [#allocation6], 1 }
 0x50a   :  { %2600 = vsyncpa [#allocation6 + $0x1], 1 }
 0x50b   :  { %2601 = vsyncpa [#allocation19], 1 }
 0x50c   :  { %2602 = vsyncpa [#allocation7], 1 }
 0x50d   :  { %2604 = vsyncpa [#allocation7 + $0x1], 1 }

</bundles_post_ra>
